<compile_context>
chip_gen: v7x
topology: tpu7x:2x2x1
jax: 0.10.0
libtpu: 0.0.40
codegen_flags: <defaults>
</compile_context>

<pallas_src>
import numpy as np
import jax
import jax.numpy as jnp
from jax import lax
from jax.experimental import pallas as pl
from jax.experimental.pallas import tpu as pltpu


def ltrhss_kernel(y_ref, feat_t_ref, cand_ref, cand_t_ref, w1_ref, w2_ref, loss_ref):
    # y_ref     : SMEM int32 [K]     -- selection order (already 0-based)
    # feat_t_ref: VMEM f32  [F, N]   -- convergence features, transposed (lane-dense)
    # cand_ref  : VMEM f32  [N, D]   -- objective vectors (dynamic sublane gather)
    # cand_t_ref: VMEM f32  [D, N]   -- objective vectors, transposed (lane-dense)
    # w1_ref    : VMEM f32  [1, F]
    # w2_ref    : SMEM f32  [6]
    # loss_ref  : VMEM f32  [1, 1]
    F, N = feat_t_ref.shape
    K = y_ref.shape[0]
    BIG = jnp.float32(1e30)

    feat_t = feat_t_ref[...]                        # [F, N]
    cand_t = cand_t_ref[...]                        # [D, N]
    w1 = w1_ref[...]                                # [1, F]

    # Hoist SMEM scalar reads of the 6 diversity weights (loop-invariant).
    w2_0 = w2_ref[0]; w2_1 = w2_ref[1]; w2_2 = w2_ref[2]
    w2_3 = w2_ref[3]; w2_4 = w2_ref[4]; w2_5 = w2_ref[5]

    lane_ids = lax.broadcasted_iota(jnp.int32, (1, N), 1)   # [1, N]

    # Convergence score for every row, lane-dense via MXU: [1,F] x [F,N] -> [1,N]
    conv = jnp.dot(w1, feat_t, preferred_element_type=jnp.float32)

    # Lane-dense squared row norms of the candidates: [1, N] (loop-invariant).
    r_lane = jnp.sum(cand_t * cand_t, axis=0, keepdims=True)

    def dist2_col(idx):
        # Squared distances of every candidate to candidate `idx`, [1, N].
        # Gram form: ||x_j - x_idx||^2 = r_j + r_idx - 2 <x_j, x_idx>  (MXU dot).
        sel_row = cand_ref[pl.ds(idx, 1), :]                                  # [1, D]
        g = jnp.dot(sel_row, cand_t, preferred_element_type=jnp.float32)      # [1, N]
        r_y = jnp.sum(sel_row * sel_row, axis=1, keepdims=True)               # [1, 1]
        return jnp.maximum(r_lane + r_y - 2.0 * g, 0.0)

    def pick(vec, idx):
        # Lane element `idx` of a [1, N] vector -> [1, 1] (masked XLU reduce).
        return jnp.sum(jnp.where(lane_ids == idx, vec, 0.0), axis=1, keepdims=True)

    # ---- first selected solution: plain listwise softmax over ALL rows ----
    y0 = y_ref[0]
    m0 = jnp.max(conv, axis=1, keepdims=True)
    lse0 = m0 + jnp.log(jnp.sum(jnp.exp(conv - m0), axis=1, keepdims=True))
    loss0 = lse0 - pick(conv, y0)                   # = -log(exp(conv[y0]) / sum exp(conv))

    # Initial incremental diversity statistics w.r.t. the selected set {y0}.
    d2_0 = dist2_col(y0)                            # [1, N]
    d_0 = jnp.sqrt(d2_0)
    sel0 = jnp.where(lane_ids == y0, 1.0, 0.0)      # selection mask, [1, N]

    # carry = (loss, sel_mask, min_dist2, max_dist2, sum_dist, sum_dist2)
    init = (loss0, sel0, d2_0, d2_0, d_0, d2_0)

    # ---- remaining selections: incrementally carried O(N) statistics ----
    def step(t, carry):
        loss, sel, min2, max2, sum_d, sum_d2 = carry
        yy = y_ref[t]
        inv_n = 1.0 / jnp.asarray(t, jnp.float32)   # |selected set| == t at this step

        # Diversity features of every row w.r.t. the current selected set.
        f_min = jnp.sqrt(min2)                      # min distance (sqrt is monotone)
        f_max = jnp.sqrt(max2)                      # max distance
        f_mean = sum_d * inv_n                      # mean distance
        f_std = jnp.sqrt(jnp.maximum(sum_d2 * inv_n - f_mean * f_mean, 0.0))
        div = (w2_0 * f_min + w2_1 * f_max + w2_2 * f_mean
               + w2_3 * sum_d + w2_4 * f_std + w2_5 * min2)

        total = conv + div                          # [1, N]
        remain = sel < 0.5                          # rows not yet selected (incl. yy)

        # Stabilized  -log( exp(total[yy]) / sum_{remain} exp(total) )
        m = jnp.max(jnp.where(remain, total, -BIG), axis=1, keepdims=True)
        s = jnp.sum(jnp.where(remain, jnp.exp(total - m), 0.0), axis=1, keepdims=True)
        loss = loss + (m + jnp.log(s)) - pick(total, yy)

        # Fold the newly selected solution into the running statistics.
        d2_new = dist2_col(yy)
        d_new = jnp.sqrt(d2_new)
        return (loss,
                jnp.where(lane_ids == yy, 1.0, sel),
                jnp.minimum(min2, d2_new),
                jnp.maximum(max2, d2_new),
                sum_d + d_new,
                sum_d2 + d2_new)

    loss_final = lax.fori_loop(1, K, step, init, unroll=True)[0]
    loss_ref[...] = loss_final


def ltrhss_forward(candidate_temp, rank_temp, feature, w1, w2):
    # ---- host-side preprocessing (numpy, exactly as the reference) ----
    candidate = candidate_temp[~np.isnan(candidate_temp).any(axis=1)]
    y = rank_temp[~np.isnan(rank_temp)].astype(np.int32) - 1

    N, D = candidate.shape
    F = feature.shape[1]
    K = int(y.shape[0])
    assert feature.shape[0] == N and w1.shape == (1, F) and w2.shape == (1, 6)
    assert K >= 1 and int(y.max()) < N and int(y.min()) >= 0

    cand_j = jnp.asarray(candidate, jnp.float32)
    feat_j = jnp.asarray(feature, jnp.float32)

    out = pl.pallas_call(
        ltrhss_kernel,
        out_shape=jax.ShapeDtypeStruct((1, 1), jnp.float32),
        in_specs=[
            pl.BlockSpec(memory_space=pltpu.MemorySpace.SMEM),   # y [K] int32
            pl.BlockSpec(memory_space=pltpu.MemorySpace.VMEM),   # feat_t [F, N]
            pl.BlockSpec(memory_space=pltpu.MemorySpace.VMEM),   # cand   [N, D]
            pl.BlockSpec(memory_space=pltpu.MemorySpace.VMEM),   # cand_t [D, N]
            pl.BlockSpec(memory_space=pltpu.MemorySpace.VMEM),   # w1     [1, F]
            pl.BlockSpec(memory_space=pltpu.MemorySpace.SMEM),   # w2     [6]
        ],
        out_specs=pl.BlockSpec(memory_space=pltpu.MemorySpace.VMEM),
    )(
        jnp.asarray(y, jnp.int32),
        feat_j.T,            # [F, N]  lane-dense features
        cand_j,              # [N, D]
        cand_j.T,            # [D, N]  lane-dense candidates
        jnp.asarray(w1, jnp.float32),
        jnp.asarray(w2, jnp.float32).reshape(6),
    )
    return out.reshape(1)    # matches the reference's [1]-shaped loss tensor


if __name__ == "__main__":
    obj_num = 4                      # num_objective
    F = obj_num + 1

    key = jax.random.PRNGKey(0)
    k_cand, k_feat, k_w1, k_w2 = jax.random.split(key, 4)

    # candidate_temp: 10 rows, 2 of which are NaN -> 8 valid solutions.
    # (np.array(..., copy=True) gives a WRITABLE numpy buffer.)
    candidate_temp = np.array(
        jax.random.uniform(k_cand, (10, obj_num)), dtype=np.float32, copy=True)
    candidate_temp[3, :] = np.nan
    candidate_temp[7, :] = np.nan
    n_valid = 8

    # rank_temp: NaNs dropped, remaining ranks are 1-based indices into the
    # valid candidates -> selection order y of length 6
    rank_temp = np.array([3.0, np.nan, 1.0, 5.0, np.nan, 7.0, 2.0, 8.0],
                         dtype=np.float32)

    # convergence features, one row per valid candidate
    feature = np.array(
        jax.random.uniform(k_feat, (n_valid, F)), dtype=np.float32, copy=True)

    # parameters: nn.Embedding(1, obj_num+1) and nn.Embedding(1, 6),
    # initialized ~ Normal(0, 0.01) as in the module __init__
    w1 = np.array(0.01 * jax.random.normal(k_w1, (1, F)), dtype=np.float32, copy=True)
    w2 = np.array(0.01 * jax.random.normal(k_w2, (1, 6)), dtype=np.float32, copy=True)

    loss = ltrhss_forward(candidate_temp, rank_temp, feature, w1, w2)
    loss = jax.block_until_ready(loss)

    assert loss.shape == (1,)
    assert np.isfinite(np.asarray(loss)).all()
    print("KERNEL_OK")
</pallas_src>

<mosaic_0001>
module attributes {stable_mosaic.version = 11 : i64} {
  func.func @ltrhss_kernel(%arg0: memref<6xi32, #tpu.memory_space<smem>>, %arg1: memref<5x8xf32, #tpu.memory_space<vmem>>, %arg2: memref<8x4xf32, #tpu.memory_space<vmem>>, %arg3: memref<4x8xf32, #tpu.memory_space<vmem>>, %arg4: memref<1x5xf32, #tpu.memory_space<vmem>>, %arg5: memref<6xf32, #tpu.memory_space<smem>>, %arg6: memref<1x1xf32, #tpu.memory_space<vmem>>) attributes {dimension_semantics = [], scalar_prefetch = 0 : i64, scratch_operands = 0 : i64, tpu.core_type = #tpu.core_type<tc>} {
    %c0 = arith.constant 0 : index
    %c0_0 = arith.constant 0 : index
    %0 = vector.load %arg1[%c0, %c0_0] : memref<5x8xf32, #tpu.memory_space<vmem>>, vector<5x8xf32>
    %c0_1 = arith.constant 0 : index
    %c0_2 = arith.constant 0 : index
    %1 = vector.load %arg3[%c0_1, %c0_2] : memref<4x8xf32, #tpu.memory_space<vmem>>, vector<4x8xf32>
    %c0_3 = arith.constant 0 : index
    %c0_4 = arith.constant 0 : index
    %2 = vector.load %arg4[%c0_3, %c0_4] : memref<1x5xf32, #tpu.memory_space<vmem>>, vector<1x5xf32>
    %c0_5 = arith.constant 0 : index
    %3 = memref.load %arg5[%c0_5] : memref<6xf32, #tpu.memory_space<smem>>
    %c1 = arith.constant 1 : index
    %4 = memref.load %arg5[%c1] : memref<6xf32, #tpu.memory_space<smem>>
    %c2 = arith.constant 2 : index
    %5 = memref.load %arg5[%c2] : memref<6xf32, #tpu.memory_space<smem>>
    %c3 = arith.constant 3 : index
    %6 = memref.load %arg5[%c3] : memref<6xf32, #tpu.memory_space<smem>>
    %c4 = arith.constant 4 : index
    %7 = memref.load %arg5[%c4] : memref<6xf32, #tpu.memory_space<smem>>
    %c5 = arith.constant 5 : index
    %8 = memref.load %arg5[%c5] : memref<6xf32, #tpu.memory_space<smem>>
    %9 = tpu.iota {dimensions = array<i32: 1>} : vector<1x8xi32>
    %cst = arith.constant dense<0.000000e+00> : vector<1x8xf32>
    %10 = tpu.matmul %2, %0, %cst {dimension_numbers = #tpu.dot_dimension_numbers<[1], [0], [0], [1], [0, 0, 1, 1], [], []>} : vector<1x5xf32>, vector<5x8xf32>, vector<1x8xf32> -> vector<1x8xf32>
    %11 = arith.mulf %1, %1 : vector<4x8xf32>
    %cst_6 = arith.constant dense<0.000000e+00> : vector<8xf32>
    %12 = vector.multi_reduction <add>, %11, %cst_6 [0] : vector<4x8xf32> to vector<8xf32>
    %13 = vector.shape_cast %12 : vector<8xf32> to vector<1x8xf32>
    %c0_7 = arith.constant 0 : index
    %14 = memref.load %arg0[%c0_7] : memref<6xi32, #tpu.memory_space<smem>>
    %cst_8 = arith.constant dense<0xFF800000> : vector<1xf32>
    %15 = vector.multi_reduction <maximumf>, %10, %cst_8 [1] : vector<1x8xf32> to vector<1xf32>
    %16 = vector.shape_cast %15 : vector<1xf32> to vector<1x1xf32>
    %17 = vector.broadcast %16 : vector<1x1xf32> to vector<1x8xf32>
    %18 = arith.subf %10, %17 : vector<1x8xf32>
    %19 = math.exp %18 : vector<1x8xf32>
    %cst_9 = arith.constant dense<0.000000e+00> : vector<1xf32>
    %20 = vector.multi_reduction <add>, %19, %cst_9 [1] : vector<1x8xf32> to vector<1xf32>
    %21 = vector.shape_cast %20 : vector<1xf32> to vector<1x1xf32>
    %22 = math.log %21 : vector<1x1xf32>
    %23 = arith.addf %16, %22 : vector<1x1xf32>
    %24 = vector.broadcast %14 : i32 to vector<1x8xi32>
    %25 = arith.cmpi eq, %9, %24 : vector<1x8xi32>
    %cst_10 = arith.constant 0.000000e+00 : f32
    %26 = vector.broadcast %cst_10 : f32 to vector<1x8xf32>
    %27 = arith.select %25, %10, %26 : vector<1x8xi1>, vector<1x8xf32>
    %cst_11 = arith.constant dense<0.000000e+00> : vector<1xf32>
    %28 = vector.multi_reduction <add>, %27, %cst_11 [1] : vector<1x8xf32> to vector<1xf32>
    %29 = vector.shape_cast %28 : vector<1xf32> to vector<1x1xf32>
    %30 = arith.subf %23, %29 : vector<1x1xf32>
    %31 = arith.index_cast %14 : i32 to index
    %c0_12 = arith.constant 0 : index
    %32 = vector.load %arg2[%31, %c0_12] : memref<8x4xf32, #tpu.memory_space<vmem>>, vector<1x4xf32>
    %cst_13 = arith.constant dense<0.000000e+00> : vector<1x8xf32>
    %33 = tpu.matmul %32, %1, %cst_13 {dimension_numbers = #tpu.dot_dimension_numbers<[1], [0], [0], [1], [0, 0, 1, 1], [], []>} : vector<1x4xf32>, vector<4x8xf32>, vector<1x8xf32> -> vector<1x8xf32>
    %34 = arith.mulf %32, %32 : vector<1x4xf32>
    %cst_14 = arith.constant dense<0.000000e+00> : vector<1xf32>
    %35 = vector.multi_reduction <add>, %34, %cst_14 [1] : vector<1x4xf32> to vector<1xf32>
    %36 = vector.shape_cast %35 : vector<1xf32> to vector<1x1xf32>
    %37 = vector.broadcast %36 : vector<1x1xf32> to vector<1x8xf32>
    %38 = arith.addf %13, %37 : vector<1x8xf32>
    %cst_15 = arith.constant 2.000000e+00 : f32
    %39 = vector.broadcast %cst_15 : f32 to vector<1x8xf32>
    %40 = arith.mulf %39, %33 : vector<1x8xf32>
    %41 = arith.subf %38, %40 : vector<1x8xf32>
    %cst_16 = arith.constant 0.000000e+00 : f32
    %42 = vector.broadcast %cst_16 : f32 to vector<1x8xf32>
    %43 = arith.maximumf %41, %42 : vector<1x8xf32>
    %44 = math.sqrt %43 : vector<1x8xf32>
    %45 = vector.broadcast %14 : i32 to vector<1x8xi32>
    %46 = arith.cmpi eq, %9, %45 : vector<1x8xi32>
    %cst_17 = arith.constant 1.000000e+00 : f32
    %cst_18 = arith.constant 0.000000e+00 : f32
    %47 = vector.broadcast %cst_17 : f32 to vector<1x8xf32>
    %48 = vector.broadcast %cst_18 : f32 to vector<1x8xf32>
    %49 = arith.select %46, %47, %48 : vector<1x8xi1>, vector<1x8xf32>
    %cst_19 = arith.constant 1.000000e+30 : f32
    %c1_i32 = arith.constant 1 : i32
    %50 = arith.index_cast %c1_i32 : i32 to index
    %51 = memref.load %arg0[%50] : memref<6xi32, #tpu.memory_space<smem>>
    %52 = arith.sitofp %c1_i32 : i32 to f32
    %cst_20 = arith.constant 1.000000e+00 : f32
    %53 = arith.divf %cst_20, %52 : f32
    %54 = math.sqrt %43 : vector<1x8xf32>
    %55 = math.sqrt %43 : vector<1x8xf32>
    %56 = vector.broadcast %53 : f32 to vector<1x8xf32>
    %57 = arith.mulf %44, %56 : vector<1x8xf32>
    %58 = vector.broadcast %53 : f32 to vector<1x8xf32>
    %59 = arith.mulf %43, %58 : vector<1x8xf32>
    %60 = arith.mulf %57, %57 : vector<1x8xf32>
    %61 = arith.subf %59, %60 : vector<1x8xf32>
    %cst_21 = arith.constant 0.000000e+00 : f32
    %62 = vector.broadcast %cst_21 : f32 to vector<1x8xf32>
    %63 = arith.maximumf %61, %62 : vector<1x8xf32>
    %64 = math.sqrt %63 : vector<1x8xf32>
    %65 = vector.broadcast %3 : f32 to vector<1x8xf32>
    %66 = arith.mulf %65, %54 : vector<1x8xf32>
    %67 = vector.broadcast %4 : f32 to vector<1x8xf32>
    %68 = arith.mulf %67, %55 : vector<1x8xf32>
    %69 = arith.addf %66, %68 : vector<1x8xf32>
    %70 = vector.broadcast %5 : f32 to vector<1x8xf32>
    %71 = arith.mulf %70, %57 : vector<1x8xf32>
    %72 = arith.addf %69, %71 : vector<1x8xf32>
    %73 = vector.broadcast %6 : f32 to vector<1x8xf32>
    %74 = arith.mulf %73, %44 : vector<1x8xf32>
    %75 = arith.addf %72, %74 : vector<1x8xf32>
    %76 = vector.broadcast %7 : f32 to vector<1x8xf32>
    %77 = arith.mulf %76, %64 : vector<1x8xf32>
    %78 = arith.addf %75, %77 : vector<1x8xf32>
    %79 = vector.broadcast %8 : f32 to vector<1x8xf32>
    %80 = arith.mulf %79, %43 : vector<1x8xf32>
    %81 = arith.addf %78, %80 : vector<1x8xf32>
    %82 = arith.addf %10, %81 : vector<1x8xf32>
    %cst_22 = arith.constant 5.000000e-01 : f32
    %83 = vector.broadcast %cst_22 : f32 to vector<1x8xf32>
    %84 = arith.cmpf olt, %49, %83 : vector<1x8xf32>
    %cst_23 = arith.constant 0.000000e+00 : f32
    %85 = arith.subf %cst_23, %cst_19 : f32
    %86 = vector.broadcast %85 : f32 to vector<1x8xf32>
    %87 = arith.select %84, %82, %86 : vector<1x8xi1>, vector<1x8xf32>
    %cst_24 = arith.constant dense<0xFF800000> : vector<1xf32>
    %88 = vector.multi_reduction <maximumf>, %87, %cst_24 [1] : vector<1x8xf32> to vector<1xf32>
    %89 = vector.shape_cast %88 : vector<1xf32> to vector<1x1xf32>
    %90 = vector.broadcast %89 : vector<1x1xf32> to vector<1x8xf32>
    %91 = arith.subf %82, %90 : vector<1x8xf32>
    %92 = math.exp %91 : vector<1x8xf32>
    %cst_25 = arith.constant 0.000000e+00 : f32
    %93 = vector.broadcast %cst_25 : f32 to vector<1x8xf32>
    %94 = arith.select %84, %92, %93 : vector<1x8xi1>, vector<1x8xf32>
    %cst_26 = arith.constant dense<0.000000e+00> : vector<1xf32>
    %95 = vector.multi_reduction <add>, %94, %cst_26 [1] : vector<1x8xf32> to vector<1xf32>
    %96 = vector.shape_cast %95 : vector<1xf32> to vector<1x1xf32>
    %97 = math.log %96 : vector<1x1xf32>
    %98 = arith.addf %89, %97 : vector<1x1xf32>
    %99 = arith.addf %30, %98 : vector<1x1xf32>
    %100 = vector.broadcast %51 : i32 to vector<1x8xi32>
    %101 = arith.cmpi eq, %9, %100 : vector<1x8xi32>
    %cst_27 = arith.constant 0.000000e+00 : f32
    %102 = vector.broadcast %cst_27 : f32 to vector<1x8xf32>
    %103 = arith.select %101, %82, %102 : vector<1x8xi1>, vector<1x8xf32>
    %cst_28 = arith.constant dense<0.000000e+00> : vector<1xf32>
    %104 = vector.multi_reduction <add>, %103, %cst_28 [1] : vector<1x8xf32> to vector<1xf32>
    %105 = vector.shape_cast %104 : vector<1xf32> to vector<1x1xf32>
    %106 = arith.subf %99, %105 : vector<1x1xf32>
    %107 = arith.index_cast %51 : i32 to index
    %c0_29 = arith.constant 0 : index
    %108 = vector.load %arg2[%107, %c0_29] : memref<8x4xf32, #tpu.memory_space<vmem>>, vector<1x4xf32>
    %cst_30 = arith.constant dense<0.000000e+00> : vector<1x8xf32>
    %109 = tpu.matmul %108, %1, %cst_30 {dimension_numbers = #tpu.dot_dimension_numbers<[1], [0], [0], [1], [0, 0, 1, 1], [], []>} : vector<1x4xf32>, vector<4x8xf32>, vector<1x8xf32> -> vector<1x8xf32>
    %110 = arith.mulf %108, %108 : vector<1x4xf32>
    %cst_31 = arith.constant dense<0.000000e+00> : vector<1xf32>
    %111 = vector.multi_reduction <add>, %110, %cst_31 [1] : vector<1x4xf32> to vector<1xf32>
    %112 = vector.shape_cast %111 : vector<1xf32> to vector<1x1xf32>
    %113 = vector.broadcast %112 : vector<1x1xf32> to vector<1x8xf32>
    %114 = arith.addf %13, %113 : vector<1x8xf32>
    %cst_32 = arith.constant 2.000000e+00 : f32
    %115 = vector.broadcast %cst_32 : f32 to vector<1x8xf32>
    %116 = arith.mulf %115, %109 : vector<1x8xf32>
    %117 = arith.subf %114, %116 : vector<1x8xf32>
    %cst_33 = arith.constant 0.000000e+00 : f32
    %118 = vector.broadcast %cst_33 : f32 to vector<1x8xf32>
    %119 = arith.maximumf %117, %118 : vector<1x8xf32>
    %120 = math.sqrt %119 : vector<1x8xf32>
    %121 = vector.broadcast %51 : i32 to vector<1x8xi32>
    %122 = arith.cmpi eq, %9, %121 : vector<1x8xi32>
    %cst_34 = arith.constant 1.000000e+00 : f32
    %123 = vector.broadcast %cst_34 : f32 to vector<1x8xf32>
    %124 = arith.select %122, %123, %49 : vector<1x8xi1>, vector<1x8xf32>
    %125 = arith.minimumf %43, %119 : vector<1x8xf32>
    %126 = arith.maximumf %43, %119 : vector<1x8xf32>
    %127 = arith.addf %44, %120 : vector<1x8xf32>
    %128 = arith.addf %43, %119 : vector<1x8xf32>
    %c2_i32 = arith.constant 2 : i32
    %129 = arith.index_cast %c2_i32 : i32 to index
    %130 = memref.load %arg0[%129] : memref<6xi32, #tpu.memory_space<smem>>
    %131 = arith.sitofp %c2_i32 : i32 to f32
    %cst_35 = arith.constant 1.000000e+00 : f32
    %132 = arith.divf %cst_35, %131 : f32
    %133 = math.sqrt %125 : vector<1x8xf32>
    %134 = math.sqrt %126 : vector<1x8xf32>
    %135 = vector.broadcast %132 : f32 to vector<1x8xf32>
    %136 = arith.mulf %127, %135 : vector<1x8xf32>
    %137 = vector.broadcast %132 : f32 to vector<1x8xf32>
    %138 = arith.mulf %128, %137 : vector<1x8xf32>
    %139 = arith.mulf %136, %136 : vector<1x8xf32>
    %140 = arith.subf %138, %139 : vector<1x8xf32>
    %cst_36 = arith.constant 0.000000e+00 : f32
    %141 = vector.broadcast %cst_36 : f32 to vector<1x8xf32>
    %142 = arith.maximumf %140, %141 : vector<1x8xf32>
    %143 = math.sqrt %142 : vector<1x8xf32>
    %144 = vector.broadcast %3 : f32 to vector<1x8xf32>
    %145 = arith.mulf %144, %133 : vector<1x8xf32>
    %146 = vector.broadcast %4 : f32 to vector<1x8xf32>
    %147 = arith.mulf %146, %134 : vector<1x8xf32>
    %148 = arith.addf %145, %147 : vector<1x8xf32>
    %149 = vector.broadcast %5 : f32 to vector<1x8xf32>
    %150 = arith.mulf %149, %136 : vector<1x8xf32>
    %151 = arith.addf %148, %150 : vector<1x8xf32>
    %152 = vector.broadcast %6 : f32 to vector<1x8xf32>
    %153 = arith.mulf %152, %127 : vector<1x8xf32>
    %154 = arith.addf %151, %153 : vector<1x8xf32>
    %155 = vector.broadcast %7 : f32 to vector<1x8xf32>
    %156 = arith.mulf %155, %143 : vector<1x8xf32>
    %157 = arith.addf %154, %156 : vector<1x8xf32>
    %158 = vector.broadcast %8 : f32 to vector<1x8xf32>
    %159 = arith.mulf %158, %125 : vector<1x8xf32>
    %160 = arith.addf %157, %159 : vector<1x8xf32>
    %161 = arith.addf %10, %160 : vector<1x8xf32>
    %cst_37 = arith.constant 5.000000e-01 : f32
    %162 = vector.broadcast %cst_37 : f32 to vector<1x8xf32>
    %163 = arith.cmpf olt, %124, %162 : vector<1x8xf32>
    %cst_38 = arith.constant 0.000000e+00 : f32
    %164 = arith.subf %cst_38, %cst_19 : f32
    %165 = vector.broadcast %164 : f32 to vector<1x8xf32>
    %166 = arith.select %163, %161, %165 : vector<1x8xi1>, vector<1x8xf32>
    %cst_39 = arith.constant dense<0xFF800000> : vector<1xf32>
    %167 = vector.multi_reduction <maximumf>, %166, %cst_39 [1] : vector<1x8xf32> to vector<1xf32>
    %168 = vector.shape_cast %167 : vector<1xf32> to vector<1x1xf32>
    %169 = vector.broadcast %168 : vector<1x1xf32> to vector<1x8xf32>
    %170 = arith.subf %161, %169 : vector<1x8xf32>
    %171 = math.exp %170 : vector<1x8xf32>
    %cst_40 = arith.constant 0.000000e+00 : f32
    %172 = vector.broadcast %cst_40 : f32 to vector<1x8xf32>
    %173 = arith.select %163, %171, %172 : vector<1x8xi1>, vector<1x8xf32>
    %cst_41 = arith.constant dense<0.000000e+00> : vector<1xf32>
    %174 = vector.multi_reduction <add>, %173, %cst_41 [1] : vector<1x8xf32> to vector<1xf32>
    %175 = vector.shape_cast %174 : vector<1xf32> to vector<1x1xf32>
    %176 = math.log %175 : vector<1x1xf32>
    %177 = arith.addf %168, %176 : vector<1x1xf32>
    %178 = arith.addf %106, %177 : vector<1x1xf32>
    %179 = vector.broadcast %130 : i32 to vector<1x8xi32>
    %180 = arith.cmpi eq, %9, %179 : vector<1x8xi32>
    %cst_42 = arith.constant 0.000000e+00 : f32
    %181 = vector.broadcast %cst_42 : f32 to vector<1x8xf32>
    %182 = arith.select %180, %161, %181 : vector<1x8xi1>, vector<1x8xf32>
    %cst_43 = arith.constant dense<0.000000e+00> : vector<1xf32>
    %183 = vector.multi_reduction <add>, %182, %cst_43 [1] : vector<1x8xf32> to vector<1xf32>
    %184 = vector.shape_cast %183 : vector<1xf32> to vector<1x1xf32>
    %185 = arith.subf %178, %184 : vector<1x1xf32>
    %186 = arith.index_cast %130 : i32 to index
    %c0_44 = arith.constant 0 : index
    %187 = vector.load %arg2[%186, %c0_44] : memref<8x4xf32, #tpu.memory_space<vmem>>, vector<1x4xf32>
    %cst_45 = arith.constant dense<0.000000e+00> : vector<1x8xf32>
    %188 = tpu.matmul %187, %1, %cst_45 {dimension_numbers = #tpu.dot_dimension_numbers<[1], [0], [0], [1], [0, 0, 1, 1], [], []>} : vector<1x4xf32>, vector<4x8xf32>, vector<1x8xf32> -> vector<1x8xf32>
    %189 = arith.mulf %187, %187 : vector<1x4xf32>
    %cst_46 = arith.constant dense<0.000000e+00> : vector<1xf32>
    %190 = vector.multi_reduction <add>, %189, %cst_46 [1] : vector<1x4xf32> to vector<1xf32>
    %191 = vector.shape_cast %190 : vector<1xf32> to vector<1x1xf32>
    %192 = vector.broadcast %191 : vector<1x1xf32> to vector<1x8xf32>
    %193 = arith.addf %13, %192 : vector<1x8xf32>
    %cst_47 = arith.constant 2.000000e+00 : f32
    %194 = vector.broadcast %cst_47 : f32 to vector<1x8xf32>
    %195 = arith.mulf %194, %188 : vector<1x8xf32>
    %196 = arith.subf %193, %195 : vector<1x8xf32>
    %cst_48 = arith.constant 0.000000e+00 : f32
    %197 = vector.broadcast %cst_48 : f32 to vector<1x8xf32>
    %198 = arith.maximumf %196, %197 : vector<1x8xf32>
    %199 = math.sqrt %198 : vector<1x8xf32>
    %200 = vector.broadcast %130 : i32 to vector<1x8xi32>
    %201 = arith.cmpi eq, %9, %200 : vector<1x8xi32>
    %cst_49 = arith.constant 1.000000e+00 : f32
    %202 = vector.broadcast %cst_49 : f32 to vector<1x8xf32>
    %203 = arith.select %201, %202, %124 : vector<1x8xi1>, vector<1x8xf32>
    %204 = arith.minimumf %125, %198 : vector<1x8xf32>
    %205 = arith.maximumf %126, %198 : vector<1x8xf32>
    %206 = arith.addf %127, %199 : vector<1x8xf32>
    %207 = arith.addf %128, %198 : vector<1x8xf32>
    %c3_i32 = arith.constant 3 : i32
    %208 = arith.index_cast %c3_i32 : i32 to index
    %209 = memref.load %arg0[%208] : memref<6xi32, #tpu.memory_space<smem>>
    %210 = arith.sitofp %c3_i32 : i32 to f32
    %cst_50 = arith.constant 1.000000e+00 : f32
    %211 = arith.divf %cst_50, %210 : f32
    %212 = math.sqrt %204 : vector<1x8xf32>
    %213 = math.sqrt %205 : vector<1x8xf32>
    %214 = vector.broadcast %211 : f32 to vector<1x8xf32>
    %215 = arith.mulf %206, %214 : vector<1x8xf32>
    %216 = vector.broadcast %211 : f32 to vector<1x8xf32>
    %217 = arith.mulf %207, %216 : vector<1x8xf32>
    %218 = arith.mulf %215, %215 : vector<1x8xf32>
    %219 = arith.subf %217, %218 : vector<1x8xf32>
    %cst_51 = arith.constant 0.000000e+00 : f32
    %220 = vector.broadcast %cst_51 : f32 to vector<1x8xf32>
    %221 = arith.maximumf %219, %220 : vector<1x8xf32>
    %222 = math.sqrt %221 : vector<1x8xf32>
    %223 = vector.broadcast %3 : f32 to vector<1x8xf32>
    %224 = arith.mulf %223, %212 : vector<1x8xf32>
    %225 = vector.broadcast %4 : f32 to vector<1x8xf32>
    %226 = arith.mulf %225, %213 : vector<1x8xf32>
    %227 = arith.addf %224, %226 : vector<1x8xf32>
    %228 = vector.broadcast %5 : f32 to vector<1x8xf32>
    %229 = arith.mulf %228, %215 : vector<1x8xf32>
    %230 = arith.addf %227, %229 : vector<1x8xf32>
    %231 = vector.broadcast %6 : f32 to vector<1x8xf32>
    %232 = arith.mulf %231, %206 : vector<1x8xf32>
    %233 = arith.addf %230, %232 : vector<1x8xf32>
    %234 = vector.broadcast %7 : f32 to vector<1x8xf32>
    %235 = arith.mulf %234, %222 : vector<1x8xf32>
    %236 = arith.addf %233, %235 : vector<1x8xf32>
    %237 = vector.broadcast %8 : f32 to vector<1x8xf32>
    %238 = arith.mulf %237, %204 : vector<1x8xf32>
    %239 = arith.addf %236, %238 : vector<1x8xf32>
    %240 = arith.addf %10, %239 : vector<1x8xf32>
    %cst_52 = arith.constant 5.000000e-01 : f32
    %241 = vector.broadcast %cst_52 : f32 to vector<1x8xf32>
    %242 = arith.cmpf olt, %203, %241 : vector<1x8xf32>
    %cst_53 = arith.constant 0.000000e+00 : f32
    %243 = arith.subf %cst_53, %cst_19 : f32
    %244 = vector.broadcast %243 : f32 to vector<1x8xf32>
    %245 = arith.select %242, %240, %244 : vector<1x8xi1>, vector<1x8xf32>
    %cst_54 = arith.constant dense<0xFF800000> : vector<1xf32>
    %246 = vector.multi_reduction <maximumf>, %245, %cst_54 [1] : vector<1x8xf32> to vector<1xf32>
    %247 = vector.shape_cast %246 : vector<1xf32> to vector<1x1xf32>
    %248 = vector.broadcast %247 : vector<1x1xf32> to vector<1x8xf32>
    %249 = arith.subf %240, %248 : vector<1x8xf32>
    %250 = math.exp %249 : vector<1x8xf32>
    %cst_55 = arith.constant 0.000000e+00 : f32
    %251 = vector.broadcast %cst_55 : f32 to vector<1x8xf32>
    %252 = arith.select %242, %250, %251 : vector<1x8xi1>, vector<1x8xf32>
    %cst_56 = arith.constant dense<0.000000e+00> : vector<1xf32>
    %253 = vector.multi_reduction <add>, %252, %cst_56 [1] : vector<1x8xf32> to vector<1xf32>
    %254 = vector.shape_cast %253 : vector<1xf32> to vector<1x1xf32>
    %255 = math.log %254 : vector<1x1xf32>
    %256 = arith.addf %247, %255 : vector<1x1xf32>
    %257 = arith.addf %185, %256 : vector<1x1xf32>
    %258 = vector.broadcast %209 : i32 to vector<1x8xi32>
    %259 = arith.cmpi eq, %9, %258 : vector<1x8xi32>
    %cst_57 = arith.constant 0.000000e+00 : f32
    %260 = vector.broadcast %cst_57 : f32 to vector<1x8xf32>
    %261 = arith.select %259, %240, %260 : vector<1x8xi1>, vector<1x8xf32>
    %cst_58 = arith.constant dense<0.000000e+00> : vector<1xf32>
    %262 = vector.multi_reduction <add>, %261, %cst_58 [1] : vector<1x8xf32> to vector<1xf32>
    %263 = vector.shape_cast %262 : vector<1xf32> to vector<1x1xf32>
    %264 = arith.subf %257, %263 : vector<1x1xf32>
    %265 = arith.index_cast %209 : i32 to index
    %c0_59 = arith.constant 0 : index
    %266 = vector.load %arg2[%265, %c0_59] : memref<8x4xf32, #tpu.memory_space<vmem>>, vector<1x4xf32>
    %cst_60 = arith.constant dense<0.000000e+00> : vector<1x8xf32>
    %267 = tpu.matmul %266, %1, %cst_60 {dimension_numbers = #tpu.dot_dimension_numbers<[1], [0], [0], [1], [0, 0, 1, 1], [], []>} : vector<1x4xf32>, vector<4x8xf32>, vector<1x8xf32> -> vector<1x8xf32>
    %268 = arith.mulf %266, %266 : vector<1x4xf32>
    %cst_61 = arith.constant dense<0.000000e+00> : vector<1xf32>
    %269 = vector.multi_reduction <add>, %268, %cst_61 [1] : vector<1x4xf32> to vector<1xf32>
    %270 = vector.shape_cast %269 : vector<1xf32> to vector<1x1xf32>
    %271 = vector.broadcast %270 : vector<1x1xf32> to vector<1x8xf32>
    %272 = arith.addf %13, %271 : vector<1x8xf32>
    %cst_62 = arith.constant 2.000000e+00 : f32
    %273 = vector.broadcast %cst_62 : f32 to vector<1x8xf32>
    %274 = arith.mulf %273, %267 : vector<1x8xf32>
    %275 = arith.subf %272, %274 : vector<1x8xf32>
    %cst_63 = arith.constant 0.000000e+00 : f32
    %276 = vector.broadcast %cst_63 : f32 to vector<1x8xf32>
    %277 = arith.maximumf %275, %276 : vector<1x8xf32>
    %278 = math.sqrt %277 : vector<1x8xf32>
    %279 = vector.broadcast %209 : i32 to vector<1x8xi32>
    %280 = arith.cmpi eq, %9, %279 : vector<1x8xi32>
    %cst_64 = arith.constant 1.000000e+00 : f32
    %281 = vector.broadcast %cst_64 : f32 to vector<1x8xf32>
    %282 = arith.select %280, %281, %203 : vector<1x8xi1>, vector<1x8xf32>
    %283 = arith.minimumf %204, %277 : vector<1x8xf32>
    %284 = arith.maximumf %205, %277 : vector<1x8xf32>
    %285 = arith.addf %206, %278 : vector<1x8xf32>
    %286 = arith.addf %207, %277 : vector<1x8xf32>
    %c4_i32 = arith.constant 4 : i32
    %287 = arith.index_cast %c4_i32 : i32 to index
    %288 = memref.load %arg0[%287] : memref<6xi32, #tpu.memory_space<smem>>
    %289 = arith.sitofp %c4_i32 : i32 to f32
    %cst_65 = arith.constant 1.000000e+00 : f32
    %290 = arith.divf %cst_65, %289 : f32
    %291 = math.sqrt %283 : vector<1x8xf32>
    %292 = math.sqrt %284 : vector<1x8xf32>
    %293 = vector.broadcast %290 : f32 to vector<1x8xf32>
    %294 = arith.mulf %285, %293 : vector<1x8xf32>
    %295 = vector.broadcast %290 : f32 to vector<1x8xf32>
    %296 = arith.mulf %286, %295 : vector<1x8xf32>
    %297 = arith.mulf %294, %294 : vector<1x8xf32>
    %298 = arith.subf %296, %297 : vector<1x8xf32>
    %cst_66 = arith.constant 0.000000e+00 : f32
    %299 = vector.broadcast %cst_66 : f32 to vector<1x8xf32>
    %300 = arith.maximumf %298, %299 : vector<1x8xf32>
    %301 = math.sqrt %300 : vector<1x8xf32>
    %302 = vector.broadcast %3 : f32 to vector<1x8xf32>
    %303 = arith.mulf %302, %291 : vector<1x8xf32>
    %304 = vector.broadcast %4 : f32 to vector<1x8xf32>
    %305 = arith.mulf %304, %292 : vector<1x8xf32>
    %306 = arith.addf %303, %305 : vector<1x8xf32>
    %307 = vector.broadcast %5 : f32 to vector<1x8xf32>
    %308 = arith.mulf %307, %294 : vector<1x8xf32>
    %309 = arith.addf %306, %308 : vector<1x8xf32>
    %310 = vector.broadcast %6 : f32 to vector<1x8xf32>
    %311 = arith.mulf %310, %285 : vector<1x8xf32>
    %312 = arith.addf %309, %311 : vector<1x8xf32>
    %313 = vector.broadcast %7 : f32 to vector<1x8xf32>
    %314 = arith.mulf %313, %301 : vector<1x8xf32>
    %315 = arith.addf %312, %314 : vector<1x8xf32>
    %316 = vector.broadcast %8 : f32 to vector<1x8xf32>
    %317 = arith.mulf %316, %283 : vector<1x8xf32>
    %318 = arith.addf %315, %317 : vector<1x8xf32>
    %319 = arith.addf %10, %318 : vector<1x8xf32>
    %cst_67 = arith.constant 5.000000e-01 : f32
    %320 = vector.broadcast %cst_67 : f32 to vector<1x8xf32>
    %321 = arith.cmpf olt, %282, %320 : vector<1x8xf32>
    %cst_68 = arith.constant 0.000000e+00 : f32
    %322 = arith.subf %cst_68, %cst_19 : f32
    %323 = vector.broadcast %322 : f32 to vector<1x8xf32>
    %324 = arith.select %321, %319, %323 : vector<1x8xi1>, vector<1x8xf32>
    %cst_69 = arith.constant dense<0xFF800000> : vector<1xf32>
    %325 = vector.multi_reduction <maximumf>, %324, %cst_69 [1] : vector<1x8xf32> to vector<1xf32>
    %326 = vector.shape_cast %325 : vector<1xf32> to vector<1x1xf32>
    %327 = vector.broadcast %326 : vector<1x1xf32> to vector<1x8xf32>
    %328 = arith.subf %319, %327 : vector<1x8xf32>
    %329 = math.exp %328 : vector<1x8xf32>
    %cst_70 = arith.constant 0.000000e+00 : f32
    %330 = vector.broadcast %cst_70 : f32 to vector<1x8xf32>
    %331 = arith.select %321, %329, %330 : vector<1x8xi1>, vector<1x8xf32>
    %cst_71 = arith.constant dense<0.000000e+00> : vector<1xf32>
    %332 = vector.multi_reduction <add>, %331, %cst_71 [1] : vector<1x8xf32> to vector<1xf32>
    %333 = vector.shape_cast %332 : vector<1xf32> to vector<1x1xf32>
    %334 = math.log %333 : vector<1x1xf32>
    %335 = arith.addf %326, %334 : vector<1x1xf32>
    %336 = arith.addf %264, %335 : vector<1x1xf32>
    %337 = vector.broadcast %288 : i32 to vector<1x8xi32>
    %338 = arith.cmpi eq, %9, %337 : vector<1x8xi32>
    %cst_72 = arith.constant 0.000000e+00 : f32
    %339 = vector.broadcast %cst_72 : f32 to vector<1x8xf32>
    %340 = arith.select %338, %319, %339 : vector<1x8xi1>, vector<1x8xf32>
    %cst_73 = arith.constant dense<0.000000e+00> : vector<1xf32>
    %341 = vector.multi_reduction <add>, %340, %cst_73 [1] : vector<1x8xf32> to vector<1xf32>
    %342 = vector.shape_cast %341 : vector<1xf32> to vector<1x1xf32>
    %343 = arith.subf %336, %342 : vector<1x1xf32>
    %344 = arith.index_cast %288 : i32 to index
    %c0_74 = arith.constant 0 : index
    %345 = vector.load %arg2[%344, %c0_74] : memref<8x4xf32, #tpu.memory_space<vmem>>, vector<1x4xf32>
    %cst_75 = arith.constant dense<0.000000e+00> : vector<1x8xf32>
    %346 = tpu.matmul %345, %1, %cst_75 {dimension_numbers = #tpu.dot_dimension_numbers<[1], [0], [0], [1], [0, 0, 1, 1], [], []>} : vector<1x4xf32>, vector<4x8xf32>, vector<1x8xf32> -> vector<1x8xf32>
    %347 = arith.mulf %345, %345 : vector<1x4xf32>
    %cst_76 = arith.constant dense<0.000000e+00> : vector<1xf32>
    %348 = vector.multi_reduction <add>, %347, %cst_76 [1] : vector<1x4xf32> to vector<1xf32>
    %349 = vector.shape_cast %348 : vector<1xf32> to vector<1x1xf32>
    %350 = vector.broadcast %349 : vector<1x1xf32> to vector<1x8xf32>
    %351 = arith.addf %13, %350 : vector<1x8xf32>
    %cst_77 = arith.constant 2.000000e+00 : f32
    %352 = vector.broadcast %cst_77 : f32 to vector<1x8xf32>
    %353 = arith.mulf %352, %346 : vector<1x8xf32>
    %354 = arith.subf %351, %353 : vector<1x8xf32>
    %cst_78 = arith.constant 0.000000e+00 : f32
    %355 = vector.broadcast %cst_78 : f32 to vector<1x8xf32>
    %356 = arith.maximumf %354, %355 : vector<1x8xf32>
    %357 = math.sqrt %356 : vector<1x8xf32>
    %358 = vector.broadcast %288 : i32 to vector<1x8xi32>
    %359 = arith.cmpi eq, %9, %358 : vector<1x8xi32>
    %cst_79 = arith.constant 1.000000e+00 : f32
    %360 = vector.broadcast %cst_79 : f32 to vector<1x8xf32>
    %361 = arith.select %359, %360, %282 : vector<1x8xi1>, vector<1x8xf32>
    %362 = arith.minimumf %283, %356 : vector<1x8xf32>
    %363 = arith.maximumf %284, %356 : vector<1x8xf32>
    %364 = arith.addf %285, %357 : vector<1x8xf32>
    %365 = arith.addf %286, %356 : vector<1x8xf32>
    %c5_i32 = arith.constant 5 : i32
    %366 = arith.index_cast %c5_i32 : i32 to index
    %367 = memref.load %arg0[%366] : memref<6xi32, #tpu.memory_space<smem>>
    %368 = arith.sitofp %c5_i32 : i32 to f32
    %cst_80 = arith.constant 1.000000e+00 : f32
    %369 = arith.divf %cst_80, %368 : f32
    %370 = math.sqrt %362 : vector<1x8xf32>
    %371 = math.sqrt %363 : vector<1x8xf32>
    %372 = vector.broadcast %369 : f32 to vector<1x8xf32>
    %373 = arith.mulf %364, %372 : vector<1x8xf32>
    %374 = vector.broadcast %369 : f32 to vector<1x8xf32>
    %375 = arith.mulf %365, %374 : vector<1x8xf32>
    %376 = arith.mulf %373, %373 : vector<1x8xf32>
    %377 = arith.subf %375, %376 : vector<1x8xf32>
    %cst_81 = arith.constant 0.000000e+00 : f32
    %378 = vector.broadcast %cst_81 : f32 to vector<1x8xf32>
    %379 = arith.maximumf %377, %378 : vector<1x8xf32>
    %380 = math.sqrt %379 : vector<1x8xf32>
    %381 = vector.broadcast %3 : f32 to vector<1x8xf32>
    %382 = arith.mulf %381, %370 : vector<1x8xf32>
    %383 = vector.broadcast %4 : f32 to vector<1x8xf32>
    %384 = arith.mulf %383, %371 : vector<1x8xf32>
    %385 = arith.addf %382, %384 : vector<1x8xf32>
    %386 = vector.broadcast %5 : f32 to vector<1x8xf32>
    %387 = arith.mulf %386, %373 : vector<1x8xf32>
    %388 = arith.addf %385, %387 : vector<1x8xf32>
    %389 = vector.broadcast %6 : f32 to vector<1x8xf32>
    %390 = arith.mulf %389, %364 : vector<1x8xf32>
    %391 = arith.addf %388, %390 : vector<1x8xf32>
    %392 = vector.broadcast %7 : f32 to vector<1x8xf32>
    %393 = arith.mulf %392, %380 : vector<1x8xf32>
    %394 = arith.addf %391, %393 : vector<1x8xf32>
    %395 = vector.broadcast %8 : f32 to vector<1x8xf32>
    %396 = arith.mulf %395, %362 : vector<1x8xf32>
    %397 = arith.addf %394, %396 : vector<1x8xf32>
    %398 = arith.addf %10, %397 : vector<1x8xf32>
    %cst_82 = arith.constant 5.000000e-01 : f32
    %399 = vector.broadcast %cst_82 : f32 to vector<1x8xf32>
    %400 = arith.cmpf olt, %361, %399 : vector<1x8xf32>
    %cst_83 = arith.constant 0.000000e+00 : f32
    %401 = arith.subf %cst_83, %cst_19 : f32
    %402 = vector.broadcast %401 : f32 to vector<1x8xf32>
    %403 = arith.select %400, %398, %402 : vector<1x8xi1>, vector<1x8xf32>
    %cst_84 = arith.constant dense<0xFF800000> : vector<1xf32>
    %404 = vector.multi_reduction <maximumf>, %403, %cst_84 [1] : vector<1x8xf32> to vector<1xf32>
    %405 = vector.shape_cast %404 : vector<1xf32> to vector<1x1xf32>
    %406 = vector.broadcast %405 : vector<1x1xf32> to vector<1x8xf32>
    %407 = arith.subf %398, %406 : vector<1x8xf32>
    %408 = math.exp %407 : vector<1x8xf32>
    %cst_85 = arith.constant 0.000000e+00 : f32
    %409 = vector.broadcast %cst_85 : f32 to vector<1x8xf32>
    %410 = arith.select %400, %408, %409 : vector<1x8xi1>, vector<1x8xf32>
    %cst_86 = arith.constant dense<0.000000e+00> : vector<1xf32>
    %411 = vector.multi_reduction <add>, %410, %cst_86 [1] : vector<1x8xf32> to vector<1xf32>
    %412 = vector.shape_cast %411 : vector<1xf32> to vector<1x1xf32>
    %413 = math.log %412 : vector<1x1xf32>
    %414 = arith.addf %405, %413 : vector<1x1xf32>
    %415 = arith.addf %343, %414 : vector<1x1xf32>
    %416 = vector.broadcast %367 : i32 to vector<1x8xi32>
    %417 = arith.cmpi eq, %9, %416 : vector<1x8xi32>
    %cst_87 = arith.constant 0.000000e+00 : f32
    %418 = vector.broadcast %cst_87 : f32 to vector<1x8xf32>
    %419 = arith.select %417, %398, %418 : vector<1x8xi1>, vector<1x8xf32>
    %cst_88 = arith.constant dense<0.000000e+00> : vector<1xf32>
    %420 = vector.multi_reduction <add>, %419, %cst_88 [1] : vector<1x8xf32> to vector<1xf32>
    %421 = vector.shape_cast %420 : vector<1xf32> to vector<1x1xf32>
    %422 = arith.subf %415, %421 : vector<1x1xf32>
    %423 = arith.index_cast %367 : i32 to index
    %c0_89 = arith.constant 0 : index
    %424 = vector.load %arg2[%423, %c0_89] : memref<8x4xf32, #tpu.memory_space<vmem>>, vector<1x4xf32>
    %cst_90 = arith.constant dense<0.000000e+00> : vector<1x8xf32>
    %425 = tpu.matmul %424, %1, %cst_90 {dimension_numbers = #tpu.dot_dimension_numbers<[1], [0], [0], [1], [0, 0, 1, 1], [], []>} : vector<1x4xf32>, vector<4x8xf32>, vector<1x8xf32> -> vector<1x8xf32>
    %426 = arith.mulf %424, %424 : vector<1x4xf32>
    %cst_91 = arith.constant dense<0.000000e+00> : vector<1xf32>
    %427 = vector.multi_reduction <add>, %426, %cst_91 [1] : vector<1x4xf32> to vector<1xf32>
    %428 = vector.shape_cast %427 : vector<1xf32> to vector<1x1xf32>
    %429 = vector.broadcast %428 : vector<1x1xf32> to vector<1x8xf32>
    %430 = arith.addf %13, %429 : vector<1x8xf32>
    %cst_92 = arith.constant 2.000000e+00 : f32
    %431 = vector.broadcast %cst_92 : f32 to vector<1x8xf32>
    %432 = arith.mulf %431, %425 : vector<1x8xf32>
    %433 = arith.subf %430, %432 : vector<1x8xf32>
    %cst_93 = arith.constant 0.000000e+00 : f32
    %434 = vector.broadcast %cst_93 : f32 to vector<1x8xf32>
    %435 = arith.maximumf %433, %434 : vector<1x8xf32>
    %436 = math.sqrt %435 : vector<1x8xf32>
    %437 = vector.broadcast %367 : i32 to vector<1x8xi32>
    %438 = arith.cmpi eq, %9, %437 : vector<1x8xi32>
    %cst_94 = arith.constant 1.000000e+00 : f32
    %439 = vector.broadcast %cst_94 : f32 to vector<1x8xf32>
    %440 = arith.select %438, %439, %361 : vector<1x8xi1>, vector<1x8xf32>
    %441 = arith.minimumf %362, %435 : vector<1x8xf32>
    %442 = arith.maximumf %363, %435 : vector<1x8xf32>
    %443 = arith.addf %364, %436 : vector<1x8xf32>
    %444 = arith.addf %365, %435 : vector<1x8xf32>
    %c5_i32_95 = arith.constant 5 : i32
    %c0_96 = arith.constant 0 : index
    %c0_97 = arith.constant 0 : index
    %445 = vector.load %arg6[%c0_96, %c0_97] : memref<1x1xf32, #tpu.memory_space<vmem>>, vector<1x1xf32>
    tpu.vector_store %arg6[%c0_96, %c0_97], %422 {strides = array<i32>} : memref<1x1xf32, #tpu.memory_space<vmem>>, vector<1x1xf32>,
    return
  }
}

</mosaic_0001>

<bundles_post_ra>
// kernel: tpu_custom_call.1
= control target key start
LH: loop header
LB: loop body
LE: loop exit
PB: predicated region body
PF: predicated region fallthrough
CT: control target
= control target key end

     0   :  { %11 = vsyncpa [#allocation4], 0  ;;  %s1739_s0 = inlined_call_operand.vmem [shape: s32[6], index: 0, kind: input, shape index: {}]   ;;  %s1740_s1 = inlined_call_operand.vmem [shape: f32[5,8], index: 1, kind: input, shape index: {}]   ;;  %s1741_s2 = inlined_call_operand.vmem [shape: f32[8,4], index: 2, kind: input, shape index: {}]   ;;  %s1742_s3 = inlined_call_operand.vmem [shape: f32[4,8], index: 3, kind: input, shape index: {}]   ;;  %s1743_s4 = inlined_call_operand.vmem [shape: f32[1,5], index: 4, kind: input, shape index: {}]   ;;  %s1744_s5 = inlined_call_operand.vmem [shape: f32[6], index: 5, kind: input, shape index: {}]   ;;  %s1745_s6 = inlined_call_operand.hbm [shape: f32[1,1], index: 6, kind: output, shape index: {}]  }
   0x1   :  { %12 = vsyncpa [#allocation6], 0 }
   0x2   :  { %13 = vsyncpa [#allocation3], 0  ;;  %s20_s23 = sshll.u32 %s1739_s0, 4  ;;  %s38_s26 = sshll.u32 %s1744_s5, 4  ;;  %s21_s23 = int_to_ptr.vmem [resolvable:$true] %s20_s23  ;;  %s39_s26 = int_to_ptr.vmem [resolvable:$true] %s38_s26 }
   0x3   :  { %s1097_s27 = scalar_lea.vmem %s21_s23, 16  ;;  %p1102_p1 = scmp.lt.s32.totalorder %s21_s23, %s21_s23 }
   0x4   :  { %p1098_p0 = scmp.ne.s32.totalorder %s21_s23, %s1097_s27  ;;  %p1103_p2 = scmp.lt.s32.totalorder %s1097_s27, %s1097_s27 }
   0x6   :  { %p1104_p3 = por %p1103_p2, %p1102_p1 }
   0x8   :  { %p1105_p4 = pnand %p1104_p3, %p1098_p0 }
   0xa   :  { %1108 = shalt.err (!%p1105_p4)
}
   0xb   :  { %s1149_s28 = smov [#allocation2]   ;;  %s1109_s29 = scalar_lea.vmem %s39_s26, 16 }
   0xc   :  { %23 = dma.vmem_to_smem %s21_s23, 16, %s1149_s28, [#allocation4]  }
   0xd   :  { %p1110_p5 = scmp.ne.s32.totalorder %s39_s26, %s1109_s29  ;;  %p1114_p6 = scmp.lt.s32.totalorder %s39_s26, %s39_s26 }
   0xe   :  { %p1115_p7 = scmp.lt.s32.totalorder %s1109_s29, %s1109_s29 }
  0x10   :  { %p1116_p8 = por %p1115_p7, %p1114_p6 }
  0x12   :  { %p1117_p9 = pnand %p1116_p8, %p1110_p5 }
  0x14   :  { %1120 = shalt.err (!%p1117_p9)
}
  0x15   :  { %s1150_s0 = smov [#allocation5]  }
  0x16   :  { %41 = dma.vmem_to_smem %s39_s26, 16, %s1150_s0, [#allocation6]  }
  0x17   :  { %1143 = dma.done.wait [#allocation4], 16  }
  0x18   :  { %1144 = vsyncadd [#allocation4], 4294967280 }
  0x19   :  { %1145 = dma.done.wait [#allocation6], 16  }
  0x1a   :  { %1146 = vsyncadd [#allocation6], 4294967280 }
  0x1b   :  { %48 = sfence }
  0x1c   :  { %v49_v0 = vld [vmem:[%s1740_s1] sm:$0x1f]  ;;  %vm64_vm0 = vcmask 1044480   ;;  %vm60_vm1 = vcmask 39936   ;;  %v1151_v1 = vmov 0.0   ;;  %vm1152_vm2 = vmmov 0  }
  0x1d   :  { %1002 = vmatprep.subr.mxu0 %v1151_v1  ;;  %1004 = vmatprep.mubr.msk.f32.mxu0 %vm1152_vm2, %v1151_v1  ;;  %v51_v2 = vld [vmem:[%s1743_s4] sm:$0x1]  ;;  %vm174_vm3 = vcmask 1043456   ;;  %s1208_s1 = sld [smem:[#allocation2]]  ;;  %s1210_s11 = sld [smem:[#allocation2 + $0x1]]  ;;  %vm170_vm4 = vcmask 31744   ;;  %v58_v42 = vlaneseq }
  0x1e   :  { %v50_v3 = vld [vmem:[%s1742_s3] sm:$0xf]  ;;  %1003 = vmatpush3.msk.msra.mxu0 %vm64_vm0, %v49_v0  ;;  %1007 = vmatprep.subr.mxu1 %v1151_v1  ;;  %s1213_s12 = sld [smem:[#allocation2 + $0x2]]  ;;  %s1215_s4 = sld [smem:[#allocation2 + $0x3]]  ;;  %vm249_vm5 = vcmask 24576   ;;  %vm139_vm6 = vcmask 60416  }
  0x1f   :  { %1005 = vmatmul.mubr.msk.f32.vlgmr.msra.gmra.mrb[0].mxu0 %vm60_vm1, %v51_v2  ;;  %1012 = vmatprep.subr.mxu0 %v1151_v1  ;;  %s1219_s3 = sld [smem:[#allocation2 + $0x4]]  ;;  %v138_v19 = vmul.f32 %v50_v3, %v50_v3  ;;  %vm148_vm7 = vcmask 57344   ;;  %s1273_s28 = sld [smem:[#allocation5]]  ;;  %v1285_v57 = vand.u32 127, %v58_v42 }
  0x20   :  { %1013 = vmatpush3.msk.msra.mxu0 %vm174_vm3, %v50_v3  ;;  %1008 = vmatpush3.msk.msra.mxu1 %vm174_vm3, %v50_v3  ;;  %s1275_s29 = sld [smem:[#allocation5 + $0x1]]  ;;  %s1277_s0 = sld [smem:[#allocation5 + $0x2]] }
  0x21   :  { %1009 = vmatprep.mubr.msk.f32.mxu1 %vm1152_vm2, %v1151_v1  ;;  %1014 = vmatprep.mubr.msk.f32.mxu0 %vm1152_vm2, %v1151_v1  ;;  %v140_v20 = vsel %vm139_vm6, %v138_v19, 0.0  ;;  %s1279_s5 = sld [smem:[#allocation5 + $0x3]]  ;;  %s971_s30 = sld [smem:[#allocation5 + $0x4]] }
  0x22   :  { %1017 = vmatprep.subr.mxu1 %v1151_v1  ;;  %1022 = vmatprep.subr.mxu0 %v1151_v1  ;;  %v141_v21 = vrot.slane %v140_v20, 4  ;;  %s989_s7 = sld [smem:[#allocation2 + $0x5]]  ;;  %s1153_s8 = smov [#allocation7]  }
  0x23   :  { %s168_s15 = scalar_lea.vmem %s1741_s2, %s1208_s1  ;;  %s317_s18 = scalar_lea.vmem %s1741_s2, %s1210_s11  ;;  %v161_v58 = vstv %s1208_s1 }
  0x24   :  { %v169_v4 = vld [vmem:[%s168_s15] sm:$0x1]  ;;  %s474_s21 = scalar_lea.vmem %s1741_s2, %s1213_s12  ;;  %s631_s24 = scalar_lea.vmem %s1741_s2, %s1215_s4  ;;  %v142_v22 = vadd.f32 %v141_v21, %v140_v20  ;;  %vm1299_vm8 = vcmp.eq.s32.totalorder %v1285_v57, %v161_v58 }
  0x25   :  { %v318_v5 = vld [vmem:[%s317_s18] sm:$0x1]  ;;  %1010 = vmatmul.mubr.msk.f32.vlgmr.msra.gmra.mrb[0].mxu1 %vm170_vm4, %v169_v4  ;;  %s788_s27 = scalar_lea.vmem %s1741_s2, %s1219_s3  ;;  %v248_v7 = vmul.f32 %v169_v4, %v169_v4  ;;  %s1271_s2 = sld [smem:[#allocation5 + $0x5]] }
  0x26   :  { %1015 = vmatmul.mubr.msk.f32.vlgmr.msra.gmra.mrb[2].mxu0 %vm170_vm4, %v318_v5  ;;  %v475_v6 = vld [vmem:[%s474_s21] sm:$0x1]  ;;  %v392_v8 = vmul.f32 %v318_v5, %v318_v5  ;;  %1018 = vmatpush3.msk.msra.mxu1 %vm174_vm3, %v50_v3  ;;  %v143_v23 = vrot.slane %v142_v22, 2  ;;  %s953_s9 = sshll.u32 %s1153_s8, 4  ;;  %s954_s9 = int_to_ptr.vmem [resolvable:$true] %s953_s9 }
  0x27   :  { %1019 = vmatprep.mubr.msk.f32.mxu1 %vm1152_vm2, %v1151_v1  ;;  %v632_v9 = vld [vmem:[%s631_s24] sm:$0x1]  ;;  %v549_v10 = vmul.f32 %v475_v6, %v475_v6  ;;  %1023 = vmatpush3.msk.msra.mxu0 %vm174_vm3, %v50_v3  ;;  %v250_v11 = vsel %vm249_vm5, %v248_v7, 0.0  ;;  %s1121_s10 = scalar_lea.vmem %s954_s9, 16  ;;  %s1125_s1 = scalar_lea.vmem %s954_s9, 32 }
  0x28   :  { %1024 = vmatprep.mubr.msk.f32.mxu0 %vm1152_vm2, %v1151_v1  ;;  %1027 = vmatprep.subr.mxu1 %v1151_v1  ;;  %v789_v12 = vld [vmem:[%s788_s27] sm:$0x1]  ;;  %v706_v14 = vmul.f32 %v632_v9, %v632_v9  ;;  %v393_v15 = vsel %vm249_vm5, %v392_v8, 0.0  ;;  %v144_v24 = vadd.f32 %v143_v23, %v142_v22  ;;  %p1122_p10 = scmp.ne.s32.totalorder %s954_s9, %s1121_s10  ;;  %p1126_p11 = scmp.lt.s32.totalorder %s954_s9, %s954_s9 }
  0x29   :  { %251 = vadd.xlane.f32.xlu0 %v250_v11  ;;  %v550_v13 = vsel %vm249_vm5, %v549_v10, 0.0  ;;  %1020 = vmatmul.mubr.msk.f32.vlgmr.msra.gmra.mrb[2].mxu1 %vm170_vm4, %v475_v6  ;;  %v863_v16 = vmul.f32 %v789_v12, %v789_v12  ;;  %v1320_v10 = vstv %s1273_s28  ;;  %p1127_p12 = scmp.lt.s32.totalorder %s1125_s1, %s1121_s10 }
  0x2a   :  { %1025 = vmatmul.mubr.msk.f32.vlgmr.msra.gmra.mrb[4].mxu0 %vm170_vm4, %v632_v9  ;;  %1028 = vmatpush3.msk.msra.mxu1 %vm174_vm3, %v50_v3  ;;  %v707_v17 = vsel %vm249_vm5, %v706_v14, 0.0  ;;  %v145_v27 = vrot.slane %v144_v24, 1  ;;  %v1317_v9 = vsel %vm1299_vm8, 1.0, %v1151_v1  ;;  %v1334_v14 = vstv %s1277_s0 }
  0x2b   :  { %1029 = vmatprep.mubr.msk.f32.mxu1 %vm1152_vm2, %v1151_v1  ;;  %551 = vadd.xlane.f32.xlu1 %v550_v13  ;;  %v864_v18 = vsel %vm249_vm5, %v863_v16, 0.0  ;;  %v1323_v11 = vstv %s1271_s2  ;;  %v1331_v13 = vstv %s1275_s29  ;;  %v1339_v16 = vstv %s971_s30  ;;  %p1128_p13 = por %p1127_p12, %p1126_p11 }
  0x2c   :  { %v146_v32 = vadd.f32 %v145_v27, %v144_v24  ;;  %v310_v1 = vstv %s1210_s11 }
  0x2d   :  { %394 = vadd.xlane.f32.xlu0 %v393_v15  ;;  %1030 = vmatmul.mubr.msk.f32.vlgmr.msra.gmra.mrb[4].mxu1 %vm170_vm4, %v789_v12  ;;  %v1337_v15 = vstv %s1279_s5  ;;  %p1129_p0 = pnand %p1128_p13, %p1122_p10 }
  0x2f   :  { %708 = vadd.xlane.f32.xlu1 %v707_v17  ;;  %v467_v17 = vstv %s1213_s12 }
  0x31   :  { %865 = vadd.xlane.f32.xlu0 %v864_v18 }
  0xb6   :  { %v252_v25 = vpop.xlane.xlu0 %251 }
  0xb7   :  { %v253_v37 = vadd.f32 %v252_v25, %v146_v32 }
  0xb8   :  { %v552_v28 = vpop.xlane.xlu1 %551 }
  0xb9   :  { %v553_v43 = vadd.f32 %v552_v28, %v146_v32 }
  0xba   :  { %v395_v31 = vpop.xlane.xlu0 %394 }
  0xbb   :  { %v396_v33 = vadd.f32 %v395_v31, %v146_v32 }
  0xbc   :  { %v709_v34 = vpop.xlane.xlu1 %708 }
  0xbd   :  { %v710_v46 = vadd.f32 %v709_v34, %v146_v32 }
  0xbe   :  { %v866_v47 = vpop.xlane.xlu0 %865 }
  0xbf   :  { %v867_v56 = vadd.f32 %v866_v47, %v146_v32 }
  0xf2   :  { %v1267_v26 = vpop.f32.mrb[0].mxu0 }
  0xf3   :  { %v1006_v29 = vpop.f32.mrb[1].mxu0  ;;  %v149_v30 = vsel %vm148_vm7, %v1267_v26, -inf }
  0xf4   :  { %150 = vmax.xlane.f32.xlu1 %v149_v30 }
  0xf8   :  { %v244_v35 = vpop.f32.mrb[0].mxu1 }
  0xf9   :  { %v388_v36 = vpop.f32.mrb[2].mxu0  ;;  %v254_v38 = vmul.f32 2.0, %v244_v35  ;;  %v1011_v40 = vpop.f32.mrb[1].mxu1 }
  0xfa   :  { %v397_v39 = vmul.f32 2.0, %v388_v36  ;;  %v1016_v41 = vpop.f32.mrb[3].mxu0 }
  0xfb   :  { %v255_v44 = vsub.f32 %v253_v37, %v254_v38 }
  0xfc   :  { %v398_v45 = vsub.f32 %v396_v33, %v397_v39  ;;  %v545_v48 = vpop.f32.mrb[2].mxu1 }
  0xfd   :  { %v702_v49 = vpop.f32.mrb[4].mxu0  ;;  %v1281_v50 = vmax.f32 %v255_v44, 0.0  ;;  %v554_v52 = vmul.f32 2.0, %v545_v48  ;;  %v1021_v54 = vpop.f32.mrb[3].mxu1 }
  0xfe   :  { %v1283_v51 = vmax.f32 %v398_v45, 0.0  ;;  %v711_v53 = vmul.f32 2.0, %v702_v49  ;;  %v1026_v55 = vpop.f32.mrb[5].mxu0 }
  0xff   :  { %v555_v60 = vsub.f32 %v553_v43, %v554_v52  ;;  %1037 = vrsqrt.f32 %v1281_v50  ;;  %vm259_vm9 = vcmp.eq.f32.partialorder %v1281_v50, inf  ;;  %vm261_vm10 = vcmp.eq.f32.partialorder %v1281_v50, 0.0 }
 0x100   :  { %v1290_v59 = vmax.f32 %v1281_v50, %v1283_v51  ;;  %v712_v61 = vsub.f32 %v710_v46, %v711_v53  ;;  %v859_v62 = vpop.f32.mrb[4].mxu1  ;;  %1039 = vrsqrt.f32 %v1283_v51  ;;  %v1305_v5 = vmin.f32 %v1281_v50, %v1283_v51 }
 0x101   :  { %v1293_v63 = vmax.f32 %v555_v60, 0.0  ;;  %v868_v0 = vmul.f32 2.0, %v859_v62  ;;  %v1031_v2 = vpop.f32.mrb[5].mxu1  ;;  %v411_v8 = vadd.f32 %v1283_v51, %v1281_v50  ;;  %v262_v18 = vand.u32 2147483648, %v1281_v50 }
 0x102   :  { %v1296_v3 = vmax.f32 %v712_v61, 0.0  ;;  %1041 = vrsqrt.f32 %v1290_v59  ;;  %vm402_vm11 = vcmp.eq.f32.partialorder %v1283_v51, inf  ;;  %vm404_vm12 = vcmp.eq.f32.partialorder %v1283_v51, 0.0 }
 0x103   :  { %v1309_v6 = vmax.f32 %v1290_v59, %v1293_v63  ;;  %v869_v7 = vsub.f32 %v867_v56, %v868_v0  ;;  %1043 = vrsqrt.f32 %v1305_v5  ;;  %v1349_v19 = vmin.f32 %v1305_v5, %v1293_v63 }
 0x104   :  { %1045 = vrsqrt.f32 %v1293_v63  ;;  %v568_v20 = vadd.f32 %v1293_v63, %v411_v8  ;;  %v405_v22 = vand.u32 2147483648, %v1283_v51  ;;  %vm415_vm13 = vcmp.eq.f32.partialorder %v1305_v5, inf }
 0x105   :  { %v1328_v12 = vmax.f32 %v1309_v6, %v1296_v3  ;;  %1047 = vrsqrt.f32 %v1309_v6  ;;  %vm417_vm14 = vcmp.eq.f32.partialorder %v1305_v5, 0.0  ;;  %v1359_v23 = vmax.f32 %v869_v7, 0.0 }
 0x106   :  { %1049 = vrsqrt.f32 %v1349_v19  ;;  %v418_v25 = vand.u32 2147483648, %v1305_v5  ;;  %vm422_vm15 = vcmp.eq.f32.partialorder %v1290_v59, inf  ;;  %vm424_vm0 = vcmp.eq.f32.partialorder %v1290_v59, 0.0 }
 0x107   :  { %v425_v28 = vand.u32 2147483648, %v1290_v59  ;;  %v1366_v29 = vmul.f32 0.5, %v411_v8  ;;  %1051 = vrsqrt.f32 %v1296_v3  ;;  %v1375_v32 = vmin.f32 %v1349_v19, %v1296_v3 }
 0x108   :  { %v1378_v33 = vadd.f32 %v1296_v3, %v568_v20  ;;  %vm559_vm1 = vcmp.eq.f32.partialorder %v1293_v63, inf  ;;  %v562_v36 = vand.u32 2147483648, %v1293_v63  ;;  %v575_v37 = vand.u32 2147483648, %v1349_v19 }
 0x109   :  { %v1038_v21 = vpop.eup %1037  ;;  %v582_v38 = vand.u32 2147483648, %v1309_v6  ;;  %vm561_vm2 = vcmp.eq.f32.partialorder %v1293_v63, 0.0  ;;  %v1389_v43 = vmul.f32 0.33333334, %v568_v20  ;;  %vm572_vm3 = vcmp.eq.f32.partialorder %v1349_v19, inf }
 0x10a   :  { %v258_v24 = vmul.f32 %v1038_v21, %v1281_v50  ;;  %v1040_v27 = vpop.eup %1039  ;;  %vm579_vm4 = vcmp.eq.f32.partialorder %v1309_v6, inf  ;;  %1053 = vrsqrt.f32 %v1328_v12  ;;  %vm574_vm5 = vcmp.eq.f32.partialorder %v1349_v19, 0.0 }
 0x10b   :  { %v401_v31 = vmul.f32 %v1040_v27, %v1283_v51  ;;  %vm581_vm6 = vcmp.eq.f32.partialorder %v1309_v6, 0.0  ;;  %1055 = vrsqrt.f32 %v1375_v32 }
 0x10c   :  { %v260_v30 = vsel %vm259_vm9, %v1281_v50, %v258_v24  ;;  %v1042_v34 = vpop.eup %1041  ;;  %vm716_vm9 = vcmp.eq.f32.partialorder %v1296_v3, inf }
 0x10d   :  { %v263_v35 = vsel %vm261_vm10, %v262_v18, %v260_v30  ;;  %v1044_v39 = vpop.eup %1043  ;;  %v403_v44 = vsel %vm402_vm11, %v1283_v51, %v401_v31  ;;  %v421_v46 = vmul.f32 %v1042_v34, %v1290_v59  ;;  %vm718_vm10 = vcmp.eq.f32.partialorder %v1296_v3, 0.0 }
 0x10e   :  { %v266_v40 = vmul.f32 %v263_v35, %v263_v35  ;;  %v277_v41 = vmul.f32 %v1320_v10, %v263_v35  ;;  %v279_v42 = vmul.f32 %v1331_v13, %v263_v35  ;;  %v414_v45 = vmul.f32 %v1044_v39, %v1305_v5  ;;  %v1046_v47 = vpop.eup %1045 }
 0x10f   :  { %v406_v49 = vsel %vm404_vm12, %v405_v22, %v403_v44  ;;  %v423_v55 = vsel %vm422_vm15, %v1290_v59, %v421_v46  ;;  %v1048_v51 = vpop.eup %1047  ;;  %v558_v61 = vmul.f32 %v1046_v47, %v1293_v63  ;;  %v282_v0 = vmul.f32 %v1334_v14, %v263_v35 }
 0x110   :  { %v267_v48 = vsub.f32 %v1281_v50, %v266_v40  ;;  %v280_v52 = vadd.f32 %v279_v42, %v277_v41  ;;  %v410_v53 = vadd.f32 %v406_v49, %v263_v35  ;;  %v416_v54 = vsel %vm415_vm13, %v1305_v5, %v414_v45  ;;  %v1050_v62 = vpop.eup %1049 }
 0x111   :  { %v419_v58 = vsel %vm417_vm14, %v418_v25, %v416_v54  ;;  %v426_v60 = vsel %vm424_vm0, %v425_v28, %v423_v55  ;;  %v1424_v18 = vmul.f32 %v1337_v15, %v263_v35  ;;  %v719_v59 = vand.u32 2147483648, %v1296_v3  ;;  %v1052_v20 = vpop.eup %1051 }
 0x112   :  { %v1412_v56 = vmax.f32 %v267_v48, 0.0  ;;  %v427_v2 = vmul.f32 0.5, %v410_v53  ;;  %v439_v7 = vmul.f32 %v419_v58, %v1320_v10  ;;  %v440_v8 = vmul.f32 %v426_v60, %v1331_v13 }
 0x113   :  { %v283_v21 = vadd.f32 %v282_v0, %v280_v52  ;;  %v560_v27 = vsel %vm559_vm1, %v1293_v63, %v558_v61  ;;  %v571_v28 = vmul.f32 %v1050_v62, %v1349_v19  ;;  %v578_v30 = vmul.f32 %v1048_v51, %v1309_v6 }
 0x114   :  { %1057 = vrsqrt.f32 %v1412_v56  ;;  %v429_v22 = vmul.f32 %v427_v2, %v427_v2  ;;  %v441_v24 = vadd.f32 %v440_v8, %v439_v7  ;;  %v442_v25 = vmul.f32 %v427_v2, %v1334_v14  ;;  %v1054_v63 = vpop.eup %1053 }
 0x115   :  { %v715_v31 = vmul.f32 %v1052_v20, %v1296_v3  ;;  %v444_v39 = vmul.f32 %v410_v53, %v1337_v15  ;;  %v563_v40 = vsel %vm561_vm2, %v562_v36, %v560_v27  ;;  %vm736_vm11 = vcmp.eq.f32.partialorder %v1328_v12, inf  ;;  %v1056_v48 = vpop.eup %1055 }
 0x116   :  { %v430_v34 = vsub.f32 %v1366_v29, %v429_v22  ;;  %v443_v35 = vadd.f32 %v442_v25, %v441_v24  ;;  %vm271_vm12 = vcmp.eq.f32.partialorder %v1412_v56, inf  ;;  %v567_v41 = vadd.f32 %v563_v40, %v410_v53 }
 0x117   :  { %v573_v42 = vsel %vm572_vm3, %v1349_v19, %v571_v28  ;;  %v580_v44 = vsel %vm579_vm4, %v1309_v6, %v578_v30  ;;  %v717_v29 = vsel %vm716_vm9, %v1296_v3, %v715_v31  ;;  %vm738_vm13 = vcmp.eq.f32.partialorder %v1328_v12, 0.0 }
 0x118   :  { %v1451_v36 = vmax.f32 %v430_v34, 0.0  ;;  %v1453_v45 = vadd.f32 %v444_v39, %v443_v35  ;;  %v576_v46 = vsel %vm574_vm5, %v575_v37, %v573_v42  ;;  %v583_v47 = vsel %vm581_vm6, %v582_v38, %v580_v44 }
 0x119   :  { %vm273_vm14 = vcmp.eq.f32.partialorder %v1412_v56, 0.0  ;;  %v584_v49 = vmul.f32 0.33333334, %v567_v41  ;;  %v596_v52 = vmul.f32 %v576_v46, %v1320_v10  ;;  %v597_v53 = vmul.f32 %v583_v47, %v1331_v13 }
 0x11a   :  { %v274_v54 = vand.u32 2147483648, %v1412_v56  ;;  %1059 = vrsqrt.f32 %v1451_v36  ;;  %v601_v55 = vmul.f32 %v567_v41, %v1337_v15  ;;  %vm729_vm15 = vcmp.eq.f32.partialorder %v1375_v32, inf }
 0x11b   :  { %v586_v37 = vmul.f32 %v584_v49, %v584_v49  ;;  %v598_v51 = vadd.f32 %v597_v53, %v596_v52  ;;  %v599_v6 = vmul.f32 %v584_v49, %v1334_v14  ;;  %v720_v38 = vsel %vm718_vm10, %v719_v59, %v717_v29 }
 0x11c   :  { %v1473_v58 = vadd.f32 %v720_v38, %v567_v41  ;;  %v728_v60 = vmul.f32 %v1056_v48, %v1375_v32  ;;  %vm731_vm0 = vcmp.eq.f32.partialorder %v1375_v32, 0.0  ;;  %v732_v61 = vand.u32 2147483648, %v1375_v32 }
 0x11d   :  { %v587_v0 = vsub.f32 %v1389_v43, %v586_v37  ;;  %v600_v2 = vadd.f32 %v599_v6, %v598_v51  ;;  %v735_v7 = vmul.f32 %v1054_v63, %v1328_v12  ;;  %v739_v8 = vand.u32 2147483648, %v1328_v12 }
 0x11e   :  { %v1058_v62 = vpop.eup %1057  ;;  %v730_v59 = vsel %vm729_vm15, %v1375_v32, %v728_v60  ;;  %v741_v20 = vmul.f32 0.25, %v1473_v58  ;;  %v742_v22 = vmul.f32 0.25, %v1378_v33  ;;  %vm294_vm1 = vcmp.lt.f32.partialorder %v1317_v9, 0.5 }
 0x11f   :  { %v270_v3 = vmul.f32 %v1058_v62, %v1412_v56  ;;  %v1485_v24 = vmax.f32 %v587_v0, 0.0  ;;  %v1487_v25 = vadd.f32 %v601_v55, %v600_v2  ;;  %v733_v43 = vsel %vm731_vm0, %v732_v61, %v730_v59 }
 0x120   :  { %v737_v27 = vsel %vm736_vm11, %v1328_v12, %v735_v7  ;;  %v743_v31 = vmul.f32 %v741_v20, %v741_v20  ;;  %v753_v34 = vmul.f32 %v733_v43, %v1320_v10  ;;  %vm1504_vm2 = vcmp.eq.s32.totalorder %v1285_v57, %v310_v1 }
 0x121   :  { %v272_v28 = vsel %vm271_vm12, %v1412_v56, %v270_v3  ;;  %v740_v30 = vsel %vm738_vm13, %v739_v8, %v737_v27  ;;  %1061 = vrsqrt.f32 %v1485_v24  ;;  %v286_v40 = vadd.f32 %v1424_v18, %v283_v21 }
 0x122   :  { %v275_v35 = vsel %vm273_vm14, %v274_v54, %v272_v28  ;;  %v744_v42 = vsub.f32 %v742_v22, %v743_v31  ;;  %v754_v44 = vmul.f32 %v740_v30, %v1331_v13  ;;  %v1515_v56 = vsel %vm1504_vm2, 1.0, %v1317_v9 }
 0x123   :  { %v288_v41 = vmul.f32 %v1339_v16, %v275_v35  ;;  %vm1520_vm3 = vcmp.eq.s32.totalorder %v1285_v57, %v467_v17  ;;  %v756_v29 = vmul.f32 %v741_v20, %v1334_v14  ;;  %1063 = vrsqrt.f32 %v1359_v23 }
 0x124   :  { %v1060_v18 = vpop.eup %1059  ;;  %v291_v63 = vmul.f32 %v1323_v11, %v1281_v50  ;;  %v1528_v46 = vmax.f32 %v744_v42, 0.0  ;;  %v755_v47 = vadd.f32 %v754_v44, %v753_v34  ;;  %vm434_vm4 = vcmp.eq.f32.partialorder %v1451_v36, inf }
 0x125   :  { %v289_v21 = vadd.f32 %v288_v41, %v286_v40  ;;  %v433_v48 = vmul.f32 %v1060_v18, %v1451_v36  ;;  %v624_v17 = vstv %s1215_s4  ;;  %v1535_v49 = vmin.f32 %v1375_v32, %v1359_v23 }
 0x126   :  { %vm436_vm5 = vcmp.eq.f32.partialorder %v1451_v36, 0.0  ;;  %v437_v53 = vand.u32 2147483648, %v1451_v36  ;;  %1065 = vrsqrt.f32 %v1528_v46  ;;  %v757_v54 = vadd.f32 %v756_v29, %v755_v47 }
 0x127   :  { %v292_v52 = vadd.f32 %v291_v63, %v289_v21  ;;  %v435_v50 = vsel %vm434_vm4, %v1451_v36, %v433_v48  ;;  %v758_v55 = vmul.f32 %v1473_v58, %v1337_v15  ;;  %v1545_v37 = vmax.f32 %v1328_v12, %v1359_v23 }
 0x128   :  { %v438_v6 = vsel %vm436_vm5, %v437_v53, %v435_v50  ;;  %v882_v38 = vadd.f32 %v1359_v23, %v1378_v33  ;;  %1067 = vrsqrt.f32 %v1535_v49  ;;  %v1557_v36 = vsel %vm1520_vm3, 1.0, %v1515_v56 }
 0x129   :  { %v1548_v51 = vadd.f32 %v292_v52, %v1267_v26  ;;  %v446_v60 = vmul.f32 %v438_v6, %v1339_v16  ;;  %vm1560_vm6 = vcmp.eq.s32.totalorder %v1285_v57, %v624_v17  ;;  %v759_v61 = vadd.f32 %v758_v55, %v757_v54 }
 0x12a   :  { %1069 = vrsqrt.f32 %v1545_v37  ;;  %v448_v7 = vmul.f32 %v1305_v5, %v1323_v11  ;;  %vm451_vm9 = vcmp.lt.f32.partialorder %v1515_v56, 0.5  ;;  %v605_v3 = vmul.f32 %v1349_v19, %v1323_v11 }
 0x12b   :  { %v295_v62 = vsel %vm294_vm1, %v1548_v51, -1e+30  ;;  %v1062_v33 = vpop.eup %1061  ;;  %v447_v2 = vadd.f32 %v446_v60, %v1453_v45  ;;  %v1579_v59 = vsel %vm1560_vm6, 1.0, %v1557_v36  ;;  %vm591_vm10 = vcmp.eq.f32.partialorder %v1485_v24, inf }
 0x12c   :  { %v296_v0 = vsel %vm148_vm7, %v295_v62, -inf  ;;  %v590_v8 = vmul.f32 %v1062_v33, %v1485_v24  ;;  %vm593_vm11 = vcmp.eq.f32.partialorder %v1485_v24, 0.0  ;;  %v594_v5 = vand.u32 2147483648, %v1485_v24 }
 0x12d   :  { %297 = vmax.xlane.f32.xlu0 %v296_v0  ;;  %v1064_v20 = vpop.eup %1063  ;;  %v449_v22 = vadd.f32 %v448_v7, %v447_v2  ;;  %vm608_vm12 = vcmp.lt.f32.partialorder %v1557_v36, 0.5  ;;  %v762_v19 = vmul.f32 %v1375_v32, %v1323_v11  ;;  %vm873_vm13 = vcmp.eq.f32.partialorder %v1359_v23, inf }
 0x12e   :  { %v592_v45 = vsel %vm591_vm10, %v1485_v24, %v590_v8  ;;  %v872_v43 = vmul.f32 %v1064_v20, %v1359_v23  ;;  %vm875_vm14 = vcmp.eq.f32.partialorder %v1359_v23, 0.0  ;;  %v876_v30 = vand.u32 2147483648, %v1359_v23 }
 0x12f   :  { %v1591_v27 = vadd.f32 %v449_v22, %v1267_v26  ;;  %v595_v28 = vsel %vm593_vm11, %v594_v5, %v592_v45  ;;  %vm748_vm15 = vcmp.eq.f32.partialorder %v1528_v46, inf  ;;  %vm750_vm0 = vcmp.eq.f32.partialorder %v1528_v46, 0.0 }
 0x130   :  { %v1066_v31 = vpop.eup %1065  ;;  %v603_v34 = vmul.f32 %v595_v28, %v1339_v16  ;;  %v874_v32 = vsel %vm873_vm13, %v1359_v23, %v872_v43  ;;  %v751_v40 = vand.u32 2147483648, %v1528_v46  ;;  %vm886_vm4 = vcmp.eq.f32.partialorder %v1535_v49, inf }
 0x131   :  { %v452_v24 = vsel %vm451_vm9, %v1591_v27, -1e+30  ;;  %v747_v35 = vmul.f32 %v1066_v31, %v1528_v46  ;;  %v877_v41 = vsel %vm875_vm14, %v876_v30, %v874_v32  ;;  %vm888_vm5 = vcmp.eq.f32.partialorder %v1535_v49, 0.0 }
 0x132   :  { %v1068_v42 = vpop.eup %1067  ;;  %v453_v44 = vsel %vm148_vm7, %v452_v24, -inf  ;;  %v604_v29 = vadd.f32 %v603_v34, %v1487_v25  ;;  %v881_v18 = vadd.f32 %v877_v41, %v1473_v58  ;;  %v889_v63 = vand.u32 2147483648, %v1535_v49 }
 0x133   :  { %454 = vmax.xlane.f32.xlu1 %v453_v44  ;;  %v749_v23 = vsel %vm748_vm15, %v1528_v46, %v747_v35  ;;  %v885_v21 = vmul.f32 %v1068_v42, %v1535_v49  ;;  %vm893_vm10 = vcmp.eq.f32.partialorder %v1545_v37, inf  ;;  %v896_v50 = vand.u32 2147483648, %v1545_v37 }
 0x134   :  { %v1070_v47 = vpop.eup %1069  ;;  %v606_v48 = vadd.f32 %v605_v3, %v604_v29  ;;  %v752_v17 = vsel %vm750_vm0, %v751_v40, %v749_v23  ;;  %v898_v25 = vmul.f32 0.2, %v881_v18  ;;  %v899_v6 = vmul.f32 0.2, %v882_v38 }
 0x135   :  { %v760_v58 = vmul.f32 %v752_v17, %v1339_v16  ;;  %v887_v52 = vsel %vm886_vm4, %v1535_v49, %v885_v21  ;;  %v892_v53 = vmul.f32 %v1070_v47, %v1545_v37  ;;  %vm895_vm11 = vcmp.eq.f32.partialorder %v1545_v37, 0.0 }
 0x136   :  { %v1620_v54 = vadd.f32 %v606_v48, %v1267_v26  ;;  %v890_v55 = vsel %vm888_vm5, %v889_v63, %v887_v52  ;;  %v900_v60 = vmul.f32 %v898_v25, %v898_v25  ;;  %vm765_vm13 = vcmp.lt.f32.partialorder %v1579_v59, 0.5 }
 0x137   :  { %v761_v62 = vadd.f32 %v760_v58, %v759_v61  ;;  %v894_v46 = vsel %vm893_vm10, %v1545_v37, %v892_v53  ;;  %v910_v33 = vmul.f32 %v890_v55, %v1320_v10  ;;  %v913_v61 = vmul.f32 %v898_v25, %v1334_v14 }
 0x138   :  { %v609_v0 = vsel %vm608_vm12, %v1620_v54, -1e+30  ;;  %v897_v2 = vsel %vm895_vm11, %v896_v50, %v894_v46  ;;  %v901_v7 = vsub.f32 %v899_v6, %v900_v60  ;;  %v915_v45 = vmul.f32 %v881_v18, %v1337_v15 }
 0x139   :  { %v610_v8 = vsel %vm148_vm7, %v609_v0, -inf  ;;  %v763_v3 = vadd.f32 %v762_v19, %v761_v62  ;;  %v911_v38 = vmul.f32 %v897_v2, %v1331_v13  ;;  %v781_v43 = vstv %s1219_s3 }
 0x13a   :  { %611 = vmax.xlane.f32.xlu0 %v610_v8  ;;  %v902_v37 = vmax.f32 %v901_v7, 0.0  ;;  %vm1642_vm0 = vcmp.eq.s32.totalorder %v1285_v57, %v781_v43  ;;  %v919_v40 = vmul.f32 %v1535_v49, %v1323_v11  ;;  %v312_v36 = vsel %vm1504_vm2, %v1548_v51, 0.0 }
 0x13b   :  { %v1633_v10 = vadd.f32 %v763_v3, %v1267_v26  ;;  %v912_v20 = vadd.f32 %v911_v38, %v910_v33  ;;  %v878_v15 = vsel %vm1642_vm0, 1.0, %v1579_v59  ;;  %v163_v38 = vsel %vm1299_vm8, %v1267_v26, 0.0 }
 0x13c   :  { %1071 = vrsqrt.f32 %v902_v37  ;;  %vm905_vm14 = vcmp.eq.f32.partialorder %v902_v37, inf  ;;  %v908_v30 = vand.u32 2147483648, %v902_v37  ;;  %vm907_vm15 = vcmp.eq.f32.partialorder %v902_v37, 0.0 }
 0x13d   :  { %v766_v22 = vsel %vm765_vm13, %v1633_v10, -1e+30  ;;  %v914_v5 = vadd.f32 %v913_v61, %v912_v20  ;;  %vm1652_vm4 = vcmp.lt.f32.partialorder %v878_v15, 0.5  ;;  %v783_v43 = vsel %vm1642_vm0, %v1633_v10, 0.0 }
 0x13e   :  { %v767_v13 = vsel %vm148_vm7, %v766_v22, -inf  ;;  %v938_v22 = vstv %s989_s7 }
 0x13f   :  { %768 = vmax.xlane.f32.xlu1 %v767_v13  ;;  %v916_v14 = vadd.f32 %v915_v45, %v914_v5  ;;  %v313_v5 = vsel %vm148_vm7, %v312_v36, 0.0  ;;  %vm939_vm8 = vcmp.eq.s32.totalorder %v1285_v57, %v938_v22  ;;  %v469_v57 = vsel %vm1520_vm3, %v1591_v27, 0.0 }
 0x146   :  { %v1072_v19 = vpop.eup %1071 }
 0x147   :  { %v904_v28 = vmul.f32 %v1072_v19, %v902_v37  ;;  %v470_v19 = vsel %vm148_vm7, %v469_v57, 0.0 }
 0x149   :  { %v906_v31 = vsel %vm905_vm14, %v902_v37, %v904_v28  ;;  %v164_v37 = vsel %vm148_vm7, %v163_v38, 0.0  ;;  %v784_v28 = vsel %vm148_vm7, %v783_v43, 0.0 }
 0x14a   :  { %v909_v32 = vsel %vm907_vm15, %v908_v30, %v906_v31 }
 0x14b   :  { %v917_v24 = vmul.f32 %v909_v32, %v1339_v16 }
 0x14d   :  { %v918_v35 = vadd.f32 %v917_v24, %v916_v14 }
 0x14f   :  { %v920_v41 = vadd.f32 %v919_v40, %v918_v35 }
 0x151   :  { %v921_v44 = vadd.f32 %v920_v41, %v1267_v26 }
 0x153   :  { %v923_v29 = vsel %vm1652_vm4, %v921_v44, -1e+30  ;;  %v940_v39 = vsel %vm939_vm8, %v921_v44, 0.0 }
 0x154   :  { %v924_v16 = vsel %vm148_vm7, %v923_v29, -inf }
 0x155   :  { %925 = vmax.xlane.f32.xlu0 %v924_v16 }
 0x181   :  { %v1660_v18 = vpop.xlane.xlu1 %150 }
 0x182   :  { %v152_v23 = vsub.f32 %v1267_v26, %v1660_v18  ;;  %v626_v26 = vsel %vm1560_vm6, %v1620_v54, 0.0 }
 0x183   :  { %v627_v45 = vsel %vm148_vm7, %v626_v26, 0.0 }
 0x184   :  { %v153_v21 = vmul.f32 1.442695, %v152_v23 }
 0x186   :  { %1073 = vpow2.f32 %v153_v21 }
 0x190   :  { %v1074_v11 = vpop.eup %1073 }
 0x191   :  { %v155_v49 = vsel %vm148_vm7, %v1074_v11, 0.0 }
 0x192   :  { %156 = vadd.xlane.f32.xlu1 %v155_v49 }
 0x1ba   :  { %v1665_v63 = vpop.xlane.xlu0 %297 }
 0x1bb   :  { %v299_v47 = vsub.f32 %v1548_v51, %v1665_v63  ;;  %v941_v51 = vsel %vm148_vm7, %v940_v39, 0.0 }
 0x1bd   :  { %v300_v48 = vmul.f32 1.442695, %v299_v47 }
 0x1bf   :  { %1075 = vpow2.f32 %v300_v48 }
 0x1c0   :  { %v1669_v17 = vpop.xlane.xlu1 %454 }
 0x1c1   :  { %v456_v25 = vsub.f32 %v1591_v27, %v1669_v17 }
 0x1c3   :  { %v457_v58 = vmul.f32 1.442695, %v456_v25 }
 0x1c5   :  { %1077 = vpow2.f32 %v457_v58 }
 0x1c7   :  { %v1673_v52 = vpop.xlane.xlu0 %611 }
 0x1c8   :  { %v613_v50 = vsub.f32 %v1620_v54, %v1673_v52 }
 0x1c9   :  { %v1076_v53 = vpop.eup %1075 }
 0x1ca   :  { %v302_v55 = vsel %vm294_vm1, %v1076_v53, 0.0  ;;  %v614_v6 = vmul.f32 1.442695, %v613_v50 }
 0x1cb   :  { %v303_v60 = vsel %vm148_vm7, %v302_v55, 0.0 }
 0x1cc   :  { %304 = vadd.xlane.f32.xlu0 %v303_v60  ;;  %1079 = vpow2.f32 %v614_v6  ;;  %v1680_v62 = vpop.xlane.xlu1 %768 }
 0x1cd   :  { %v770_v46 = vsub.f32 %v1633_v10, %v1680_v62 }
 0x1cf   :  { %v1078_v33 = vpop.eup %1077  ;;  %v771_v0 = vmul.f32 1.442695, %v770_v46 }
 0x1d0   :  { %v459_v2 = vsel %vm451_vm9, %v1078_v33, 0.0 }
 0x1d1   :  { %1081 = vpow2.f32 %v771_v0  ;;  %v460_v7 = vsel %vm148_vm7, %v459_v2, 0.0 }
 0x1d2   :  { %461 = vadd.xlane.f32.xlu1 %v460_v7 }
 0x1d6   :  { %v1080_v9 = vpop.eup %1079 }
 0x1d7   :  { %v616_v8 = vsel %vm608_vm12, %v1080_v9, 0.0 }
 0x1d8   :  { %v617_v3 = vsel %vm148_vm7, %v616_v8, 0.0 }
 0x1d9   :  { %618 = vadd.xlane.f32.xlu0 %v617_v3 }
 0x1db   :  { %v1082_v61 = vpop.eup %1081 }
 0x1dc   :  { %v773_v56 = vsel %vm765_vm13, %v1082_v61, 0.0 }
 0x1dd   :  { %v774_v20 = vsel %vm148_vm7, %v773_v56, 0.0  ;;  %165 = vadd.xlane.f32.xlu0 %v164_v37 }
 0x1de   :  { %775 = vadd.xlane.f32.xlu1 %v774_v20 }
 0x1e1   :  { %314 = vadd.xlane.f32.xlu0 %v313_v5 }
 0x1e2   :  { %v1704_v4 = vpop.xlane.xlu0 %925 }
 0x1e3   :  { %v927_v59 = vsub.f32 %v921_v44, %v1704_v4 }
 0x1e5   :  { %v928_v13 = vmul.f32 1.442695, %v927_v59  ;;  %628 = vadd.xlane.f32.xlu0 %v627_v45 }
 0x1e7   :  { %1083 = vpow2.f32 %v928_v13 }
 0x1e9   :  { %942 = vadd.xlane.f32.xlu0 %v941_v51 }
 0x1f1   :  { %v1084_v14 = vpop.eup %1083 }
 0x1f2   :  { %v930_v12 = vsel %vm1652_vm4, %v1084_v14, 0.0 }
 0x1f3   :  { %v931_v54 = vsel %vm148_vm7, %v930_v12, 0.0  ;;  %vm945_vm7 = vcmask 0  }
 0x1f4   :  { %932 = vadd.xlane.f32.xlu1 %v931_v54 }
 0x1f8   :  { %471 = vadd.xlane.f32.xlu1 %v470_v19 }
 0x1fc   :  { %785 = vadd.xlane.f32.xlu1 %v784_v28 }
 0x21f   :  { %v157_v30 = vpop.xlane.xlu1 %156 }
 0x220   :  { %1085 = vlog2.f32 %v157_v30 }
 0x22a   :  { %v1086_v24 = vpop.eup %1085 }
 0x22b   :  { %v159_v27 = vmul.f32 0.6931472, %v1086_v24 }
 0x22d   :  { %v160_v41 = vadd.f32 %v159_v27, %v1660_v18 }
 0x259   :  { %v305_v31 = vpop.xlane.xlu0 %304 }
 0x25a   :  { %1087 = vlog2.f32 %v305_v31 }
 0x25f   :  { %v462_v32 = vpop.xlane.xlu1 %461 }
 0x260   :  { %1089 = vlog2.f32 %v462_v32 }
 0x264   :  { %v1088_v1 = vpop.eup %1087 }
 0x265   :  { %v307_v35 = vmul.f32 0.6931472, %v1088_v1 }
 0x266   :  { %v619_v15 = vpop.xlane.xlu0 %618 }
 0x267   :  { %1091 = vlog2.f32 %v619_v15  ;;  %v308_v42 = vadd.f32 %v307_v35, %v1665_v63 }
 0x26a   :  { %v166_v40 = vpop.xlane.xlu0 %165  ;;  %v1090_v44 = vpop.eup %1089 }
 0x26b   :  { %v776_v34 = vpop.xlane.xlu1 %775  ;;  %v167_v10 = vsub.f32 %v160_v41, %v166_v40  ;;  %v464_v29 = vmul.f32 0.6931472, %v1090_v44 }
 0x26c   :  { %1093 = vlog2.f32 %v776_v34 }
 0x26d   :  { %v309_v16 = vadd.f32 %v308_v42, %v167_v10  ;;  %v465_v49 = vadd.f32 %v464_v29, %v1669_v17 }
 0x26e   :  { %v315_v23 = vpop.xlane.xlu0 %314 }
 0x26f   :  { %v316_v11 = vsub.f32 %v309_v16, %v315_v23 }
 0x271   :  { %v1092_v21 = vpop.eup %1091  ;;  %v466_v25 = vadd.f32 %v465_v49, %v316_v11 }
 0x272   :  { %v621_v47 = vmul.f32 0.6931472, %v1092_v21  ;;  %v629_v6 = vpop.xlane.xlu0 %628 }
 0x274   :  { %v622_v18 = vadd.f32 %v621_v47, %v1673_v52 }
 0x276   :  { %v1094_v58 = vpop.eup %1093  ;;  %v943_v3 = vpop.xlane.xlu0 %942 }
 0x277   :  { %v778_v50 = vmul.f32 0.6931472, %v1094_v58 }
 0x279   :  { %v779_v46 = vadd.f32 %v778_v50, %v1680_v62 }
 0x281   :  { %v933_v48 = vpop.xlane.xlu1 %932 }
 0x282   :  { %1095 = vlog2.f32 %v933_v48 }
 0x285   :  { %v472_v53 = vpop.xlane.xlu1 %471 }
 0x286   :  { %v473_v55 = vsub.f32 %v466_v25, %v472_v53 }
 0x288   :  { %v623_v63 = vadd.f32 %v622_v18, %v473_v55 }
 0x289   :  { %v786_v7 = vpop.xlane.xlu1 %785 }
 0x28a   :  { %v630_v60 = vsub.f32 %v623_v63, %v629_v6 }
 0x28c   :  { %v1096_v33 = vpop.eup %1095  ;;  %v780_v0 = vadd.f32 %v779_v46, %v630_v60 }
 0x28d   :  { %v935_v2 = vmul.f32 0.6931472, %v1096_v33 }
 0x28e   :  { %v787_v17 = vsub.f32 %v780_v0, %v786_v7 }
 0x28f   :  { %v936_v9 = vadd.f32 %v935_v2, %v1704_v4 }
 0x291   :  { %v937_v8 = vadd.f32 %v936_v9, %v787_v17 }
 0x293   :  { %v944_v52 = vsub.f32 %v937_v8, %v943_v3 }
 0x295   :  { %946 = vst.msk [vmem:[#allocation7] sm:$0x1] %vm945_vm7, %v944_v52 }
 0x296   :  { %1132 = shalt.err (!%p1129_p0)
}
 0x297   :  { %s1133_s4 = scalar_lea.hbm %s1745_s6, 16 }
 0x298   :  { %p1134_p1 = scmp.ne.s32.totalorder %s1745_s6, %s1133_s4  ;;  %p1137_p2 = scmp.lt.u32.totalorder %s1133_s4, %s1745_s6 }
 0x29a   :  { %p1139_p3 = pnand %p1137_p2, %p1134_p1 }
 0x29c   :  { %1142 = shalt.err (!%p1139_p3)
}
 0x29d   :  { %956 = dma.vmem_to_hbm [thread:$0]  %s954_s9, 16, %s1745_s6, [#allocation3]  }
 0x29e   :  { %1147 = dma.done.wait [#allocation3], 16  }
 0x29f   :  { %1148 = vsyncadd [#allocation3], 4294967280 }
 0x2a0   :  { %960 = vsyncpa [#allocation3], 1 }
 0x2a1   :  { %961 = vsyncpa [#allocation4], 1 }
 0x2a2   :  { %962 = vsyncpa [#allocation6], 1 }

</bundles_post_ra>
